<compile_context>
chip_gen: v6e
topology: v6e:2x2x1
jax: 0.10.0
libtpu: 0.0.40
codegen_flags: <defaults>
</compile_context>

<pallas_src>
import functools

import jax
import jax.numpy as jnp
import numpy as np
from jax.experimental import pallas as pl
from jax.experimental.pallas import tpu as pltpu


def xunitd_kernel(x_ref, w1_ref, b1_ref, wd_ref, bd_ref, o_ref, pad_ref,
                  *, k, pad, pad_top):
    """One (batch, output-channel) pair per grid step.

    x_ref  : (C, H, W)   full input image for this batch element (VMEM)
    w1_ref : (C*C,)      1x1 conv weight, flattened (c_out*C + c_in)   (SMEM)
    b1_ref : (C,)        1x1 conv bias                                  (SMEM)
    wd_ref : (C*k*k,)    depthwise weight, flattened (c*k*k + dy*k + dx)(SMEM)
    bd_ref : (C,)        depthwise conv bias                            (SMEM)
    o_ref  : (H, W)      output tile for channel c of batch b
    pad_ref: (pad_top + H + pad, W + 2*pad) VMEM scratch (padded feature map,
             interior rows start at the sublane-aligned offset `pad_top`)
    """
    C, H, W = x_ref.shape
    c = pl.program_id(1)                         # output channel of this step
    Wp = W + 2 * pad

    # --- 1x1 conv (channel mix) + bias + ReLU, output channel c only ---------
    # C is small: C scalar*slab VPU MACs (scalars live in SMEM) instead of a
    # tiny matmul that would waste the MXU.
    y = x_ref[0].astype(jnp.float32) * w1_ref[c * C + 0]
    for cin in range(1, C):                      # static unroll, C is small
        y = y + x_ref[cin].astype(jnp.float32) * w1_ref[c * C + cin]
    y = jnp.maximum(y + b1_ref[c], 0.0)          # (H, W)

    # --- write y into the padded scratch --------------------------------------
    # Interior rows start at `pad_top` (multiple of 8 -> sublane-aligned store).
    # Only the halo rim is zeroed each step: cheap, and stays correct even when
    # the "parallel" grid is split across TensorCores (a zero-once-at-step-0
    # scheme would not, since each core has its own scratch).
    if pad > 0:
        zrow = jnp.zeros((pad, Wp), jnp.float32)
        zcol = jnp.zeros((H, pad), jnp.float32)
        pad_ref[pad_top - pad:pad_top, :] = zrow                 # top halo
        pad_ref[pad_top + H:pad_top + H + pad, :] = zrow         # bottom halo
        pad_ref[pad_top:pad_top + H, 0:pad] = zcol               # left halo
        pad_ref[pad_top:pad_top + H, pad + W:Wp] = zcol          # right halo
    pad_ref[pad_top:pad_top + H, pad:pad + W] = y                # interior

    # --- depthwise k x k conv + bias, then sigmoid gate ------------------------
    # outer dx: one lane-shifted window load per dx, reused for all k dy taps.
    r0 = pad_top - pad                            # first row of the read window
    wbase = c * (k * k)
    acc = jnp.zeros((H, W), jnp.float32)
    for dx in range(k):
        col = pad_ref[r0:r0 + H + 2 * pad, dx:dx + W]            # (H+2p, W)
        for dy in range(k):
            acc = acc + col[dy:dy + H, :] * wd_ref[wbase + dy * k + dx]
    gate = jax.nn.sigmoid(acc + bd_ref[c])

    # --- gated output: re-read x (channel c) instead of keeping it live -------
    o_ref[...] = (x_ref[c].astype(jnp.float32) * gate).astype(o_ref.dtype)


def xunitd_forward(x, w1, b1, wd, bd):
    """xUnitD forward (batch_norm=False).

    x : (B, C, H, W);  w1 : (C, C, 1, 1);  b1 : (C,);
    wd: (C, 1, k, k) depthwise weight;     bd : (C,).
    """
    B, C, H, W = x.shape
    k = int(wd.shape[-1])
    assert k % 2 == 1, "xUnitD Pallas kernel requires an odd kernel_size"
    pad = k // 2
    pad_top = ((pad + 7) // 8) * 8 if pad > 0 else 0   # sublane-aligned interior

    # Tiny parameters -> flatten and ship to SMEM, consumed as scalars.
    w1f = w1.reshape(C * C).astype(jnp.float32)          # (c_out * C + c_in)
    wdf = wd.reshape(C * k * k).astype(jnp.float32)      # (c * k*k + dy*k + dx)
    b1f = b1.astype(jnp.float32)
    bdf = bd.astype(jnp.float32)

    kern = functools.partial(xunitd_kernel, k=k, pad=pad, pad_top=pad_top)

    hw = H * W
    cost = pl.CostEstimate(
        flops=2 * B * C * hw * (C + k * k) + 6 * B * C * hw,
        transcendentals=B * C * hw,
        bytes_accessed=2 * B * C * hw * x.dtype.itemsize,
    )

    smem_spec = pl.BlockSpec(memory_space=pltpu.MemorySpace.SMEM)
    out = pl.pallas_call(
        kern,
        out_shape=jax.ShapeDtypeStruct((B, C, H, W), x.dtype),
        grid_spec=pltpu.PrefetchScalarGridSpec(
            num_scalar_prefetch=0,
            grid=(B, C),
            in_specs=[
                # Full image for batch b; same block index across the C axis,
                # so it is DMA'd once per batch element and stays resident.
                pl.BlockSpec((pl.Squeezed(), C, H, W), lambda b, c: (b, 0, 0, 0)),
                smem_spec, smem_spec, smem_spec, smem_spec,
            ],
            out_specs=pl.BlockSpec((pl.Squeezed(), pl.Squeezed(), H, W),
                                   lambda b, c: (b, c, 0, 0)),
            scratch_shapes=[
                pltpu.VMEM((pad_top + H + pad, W + 2 * pad), jnp.float32),
            ],
        ),
        compiler_params=pltpu.CompilerParams(
            dimension_semantics=("parallel", "parallel"),
            vmem_limit_bytes=32 * 1024 * 1024,
        ),
        cost_estimate=cost,
    )(x, w1f, b1f, wdf, bdf)
    return out


def ref_forward(x, w1, b1, wd, bd):
    """Pure-JAX reference mirroring the PyTorch module (batch_norm=False)."""
    C = x.shape[1]
    k = wd.shape[-1]
    pad = k // 2
    y = jax.lax.conv_general_dilated(
        x, w1, window_strides=(1, 1), padding=[(0, 0), (0, 0)],
        dimension_numbers=("NCHW", "OIHW", "NCHW")) + b1[None, :, None, None]
    y = jnp.maximum(y, 0.0)
    z = jax.lax.conv_general_dilated(
        y, wd, window_strides=(1, 1), padding=[(pad, pad), (pad, pad)],
        dimension_numbers=("NCHW", "OIHW", "NCHW"),
        feature_group_count=C) + bd[None, :, None, None]
    return x * jax.nn.sigmoid(z)


if __name__ == "__main__":
    B, C, H, W = 2, 4, 16, 16
    K = 7

    key = jax.random.PRNGKey(0)
    kx, kw1, kb1, kwd, kbd = jax.random.split(key, 5)

    x = jax.random.normal(kx, (B, C, H, W), jnp.float32)
    # Deterministic parameter init (shapes match torch.nn.Conv2d defaults).
    w1 = jax.random.normal(kw1, (C, C, 1, 1), jnp.float32) * (1.0 / np.sqrt(C))
    b1 = jax.random.normal(kb1, (C,), jnp.float32) * 0.1
    wd = jax.random.normal(kwd, (C, 1, K, K), jnp.float32) * (1.0 / K)
    bd = jax.random.normal(kbd, (C,), jnp.float32) * 0.1

    out = xunitd_forward(x, w1, b1, wd, bd)
    out = jax.block_until_ready(out)

    expected = jax.block_until_ready(ref_forward(x, w1, b1, wd, bd))
    assert out.shape == (B, C, H, W)
    np.testing.assert_allclose(np.asarray(out), np.asarray(expected),
                               rtol=1e-5, atol=1e-5)
    print("KERNEL_OK")
</pallas_src>

<mosaic_0001>
module attributes {stable_mosaic.version = 11 : i64} {
  func.func @xunitd_kernel(%arg0: i32, %arg1: i32, %arg2: memref<1x4x16x16xf32, #tpu.memory_space<vmem>>, %arg3: memref<16xf32, #tpu.memory_space<smem>>, %arg4: memref<4xf32, #tpu.memory_space<smem>>, %arg5: memref<196xf32, #tpu.memory_space<smem>>, %arg6: memref<4xf32, #tpu.memory_space<smem>>, %arg7: memref<1x1x16x16xf32, #tpu.memory_space<vmem>>, %arg8: memref<27x22xf32, #tpu.memory_space<vmem>>) attributes {dimension_semantics = [#tpu.dimension_semantics<parallel>, #tpu.dimension_semantics<parallel>], iteration_bounds = array<i64: 2, 4>, scalar_prefetch = 0 : i64, scratch_operands = 1 : i64, tpu.core_type = #tpu.core_type<tc>, window_params = [{transform_indices = @transform_0, window_bounds = array<i64: 1, 4, 16, 16>}, {transform_indices = @transform_1, window_bounds = array<i64: 16>}, {transform_indices = @transform_2, window_bounds = array<i64: 4>}, {transform_indices = @transform_3, window_bounds = array<i64: 196>}, {transform_indices = @transform_4, window_bounds = array<i64: 4>}, {transform_indices = @transform_5, window_bounds = array<i64: 1, 1, 16, 16>}]} {
    %c0 = arith.constant 0 : index
    %c0_0 = arith.constant 0 : index
    %c0_1 = arith.constant 0 : index
    %c0_2 = arith.constant 0 : index
    %0 = vector.load %arg2[%c0, %c0_0, %c0_1, %c0_2] : memref<1x4x16x16xf32, #tpu.memory_space<vmem>>, vector<1x1x16x16xf32>
    %1 = vector.shape_cast %0 : vector<1x1x16x16xf32> to vector<16x16xf32>
    %c4_i32 = arith.constant 4 : i32
    %2 = arith.muli %arg1, %c4_i32 : i32
    %c0_i32 = arith.constant 0 : i32
    %3 = arith.addi %2, %c0_i32 : i32
    %4 = arith.index_cast %3 : i32 to index
    %5 = memref.load %arg3[%4] : memref<16xf32, #tpu.memory_space<smem>>
    %6 = vector.broadcast %5 : f32 to vector<16x16xf32>
    %7 = arith.mulf %1, %6 : vector<16x16xf32>
    %c0_3 = arith.constant 0 : index
    %c1 = arith.constant 1 : index
    %c0_4 = arith.constant 0 : index
    %c0_5 = arith.constant 0 : index
    %8 = vector.load %arg2[%c0_3, %c1, %c0_4, %c0_5] : memref<1x4x16x16xf32, #tpu.memory_space<vmem>>, vector<1x1x16x16xf32>
    %9 = vector.shape_cast %8 : vector<1x1x16x16xf32> to vector<16x16xf32>
    %c4_i32_6 = arith.constant 4 : i32
    %10 = arith.muli %arg1, %c4_i32_6 : i32
    %c1_i32 = arith.constant 1 : i32
    %11 = arith.addi %10, %c1_i32 : i32
    %12 = arith.index_cast %11 : i32 to index
    %13 = memref.load %arg3[%12] : memref<16xf32, #tpu.memory_space<smem>>
    %14 = vector.broadcast %13 : f32 to vector<16x16xf32>
    %15 = arith.mulf %9, %14 : vector<16x16xf32>
    %16 = arith.addf %7, %15 : vector<16x16xf32>
    %c0_7 = arith.constant 0 : index
    %c2 = arith.constant 2 : index
    %c0_8 = arith.constant 0 : index
    %c0_9 = arith.constant 0 : index
    %17 = vector.load %arg2[%c0_7, %c2, %c0_8, %c0_9] : memref<1x4x16x16xf32, #tpu.memory_space<vmem>>, vector<1x1x16x16xf32>
    %18 = vector.shape_cast %17 : vector<1x1x16x16xf32> to vector<16x16xf32>
    %c4_i32_10 = arith.constant 4 : i32
    %19 = arith.muli %arg1, %c4_i32_10 : i32
    %c2_i32 = arith.constant 2 : i32
    %20 = arith.addi %19, %c2_i32 : i32
    %21 = arith.index_cast %20 : i32 to index
    %22 = memref.load %arg3[%21] : memref<16xf32, #tpu.memory_space<smem>>
    %23 = vector.broadcast %22 : f32 to vector<16x16xf32>
    %24 = arith.mulf %18, %23 : vector<16x16xf32>
    %25 = arith.addf %16, %24 : vector<16x16xf32>
    %c0_11 = arith.constant 0 : index
    %c3 = arith.constant 3 : index
    %c0_12 = arith.constant 0 : index
    %c0_13 = arith.constant 0 : index
    %26 = vector.load %arg2[%c0_11, %c3, %c0_12, %c0_13] : memref<1x4x16x16xf32, #tpu.memory_space<vmem>>, vector<1x1x16x16xf32>
    %27 = vector.shape_cast %26 : vector<1x1x16x16xf32> to vector<16x16xf32>
    %c4_i32_14 = arith.constant 4 : i32
    %28 = arith.muli %arg1, %c4_i32_14 : i32
    %c3_i32 = arith.constant 3 : i32
    %29 = arith.addi %28, %c3_i32 : i32
    %30 = arith.index_cast %29 : i32 to index
    %31 = memref.load %arg3[%30] : memref<16xf32, #tpu.memory_space<smem>>
    %32 = vector.broadcast %31 : f32 to vector<16x16xf32>
    %33 = arith.mulf %27, %32 : vector<16x16xf32>
    %34 = arith.addf %25, %33 : vector<16x16xf32>
    %35 = arith.index_cast %arg1 : i32 to index
    %36 = memref.load %arg4[%35] : memref<4xf32, #tpu.memory_space<smem>>
    %37 = vector.broadcast %36 : f32 to vector<16x16xf32>
    %38 = arith.addf %34, %37 : vector<16x16xf32>
    %cst = arith.constant 0.000000e+00 : f32
    %39 = vector.broadcast %cst : f32 to vector<16x16xf32>
    %40 = arith.maximumf %38, %39 : vector<16x16xf32>
    %cst_15 = arith.constant 0.000000e+00 : f32
    %41 = vector.broadcast %cst_15 : f32 to vector<3x22xf32>
    %cst_16 = arith.constant 0.000000e+00 : f32
    %42 = vector.broadcast %cst_16 : f32 to vector<16x3xf32>
    %c5 = arith.constant 5 : index
    %c0_17 = arith.constant 0 : index
    %43 = vector.load %arg8[%c5, %c0_17] : memref<27x22xf32, #tpu.memory_space<vmem>>, vector<3x22xf32>
    tpu.vector_store %arg8[%c5, %c0_17], %41 {strides = array<i32>} : memref<27x22xf32, #tpu.memory_space<vmem>>, vector<3x22xf32>,
    %c24 = arith.constant 24 : index
    %c0_18 = arith.constant 0 : index
    %44 = vector.load %arg8[%c24, %c0_18] : memref<27x22xf32, #tpu.memory_space<vmem>>, vector<3x22xf32>
    tpu.vector_store %arg8[%c24, %c0_18], %41 {strides = array<i32>} : memref<27x22xf32, #tpu.memory_space<vmem>>, vector<3x22xf32>,
    %c8 = arith.constant 8 : index
    %c0_19 = arith.constant 0 : index
    %45 = vector.load %arg8[%c8, %c0_19] : memref<27x22xf32, #tpu.memory_space<vmem>>, vector<16x3xf32>
    tpu.vector_store %arg8[%c8, %c0_19], %42 {strides = array<i32>} : memref<27x22xf32, #tpu.memory_space<vmem>>, vector<16x3xf32>,
    %c8_20 = arith.constant 8 : index
    %c19 = arith.constant 19 : index
    %46 = vector.load %arg8[%c8_20, %c19] : memref<27x22xf32, #tpu.memory_space<vmem>>, vector<16x3xf32>
    tpu.vector_store %arg8[%c8_20, %c19], %42 {strides = array<i32>} : memref<27x22xf32, #tpu.memory_space<vmem>>, vector<16x3xf32>,
    %c8_21 = arith.constant 8 : index
    %c3_22 = arith.constant 3 : index
    %47 = vector.load %arg8[%c8_21, %c3_22] : memref<27x22xf32, #tpu.memory_space<vmem>>, vector<16x16xf32>
    tpu.vector_store %arg8[%c8_21, %c3_22], %40 {strides = array<i32>} : memref<27x22xf32, #tpu.memory_space<vmem>>, vector<16x16xf32>,
    %c49_i32 = arith.constant 49 : i32
    %48 = arith.muli %arg1, %c49_i32 : i32
    %cst_23 = arith.constant 0.000000e+00 : f32
    %49 = vector.broadcast %cst_23 : f32 to vector<16x16xf32>
    %c5_24 = arith.constant 5 : index
    %c0_25 = arith.constant 0 : index
    %50 = vector.load %arg8[%c5_24, %c0_25] : memref<27x22xf32, #tpu.memory_space<vmem>>, vector<22x16xf32>
    %51 = vector.extract_strided_slice %50 {offsets = [0, 0], sizes = [16, 16], strides = [1, 1]} : vector<22x16xf32> to vector<16x16xf32>
    %c0_i32_26 = arith.constant 0 : i32
    %52 = arith.addi %48, %c0_i32_26 : i32
    %c0_i32_27 = arith.constant 0 : i32
    %53 = arith.addi %52, %c0_i32_27 : i32
    %54 = arith.index_cast %53 : i32 to index
    %55 = memref.load %arg5[%54] : memref<196xf32, #tpu.memory_space<smem>>
    %56 = vector.broadcast %55 : f32 to vector<16x16xf32>
    %57 = arith.mulf %51, %56 : vector<16x16xf32>
    %58 = arith.addf %49, %57 : vector<16x16xf32>
    %59 = vector.extract_strided_slice %50 {offsets = [1, 0], sizes = [16, 16], strides = [1, 1]} : vector<22x16xf32> to vector<16x16xf32>
    %c7_i32 = arith.constant 7 : i32
    %60 = arith.addi %48, %c7_i32 : i32
    %c0_i32_28 = arith.constant 0 : i32
    %61 = arith.addi %60, %c0_i32_28 : i32
    %62 = arith.index_cast %61 : i32 to index
    %63 = memref.load %arg5[%62] : memref<196xf32, #tpu.memory_space<smem>>
    %64 = vector.broadcast %63 : f32 to vector<16x16xf32>
    %65 = arith.mulf %59, %64 : vector<16x16xf32>
    %66 = arith.addf %58, %65 : vector<16x16xf32>
    %67 = vector.extract_strided_slice %50 {offsets = [2, 0], sizes = [16, 16], strides = [1, 1]} : vector<22x16xf32> to vector<16x16xf32>
    %c14_i32 = arith.constant 14 : i32
    %68 = arith.addi %48, %c14_i32 : i32
    %c0_i32_29 = arith.constant 0 : i32
    %69 = arith.addi %68, %c0_i32_29 : i32
    %70 = arith.index_cast %69 : i32 to index
    %71 = memref.load %arg5[%70] : memref<196xf32, #tpu.memory_space<smem>>
    %72 = vector.broadcast %71 : f32 to vector<16x16xf32>
    %73 = arith.mulf %67, %72 : vector<16x16xf32>
    %74 = arith.addf %66, %73 : vector<16x16xf32>
    %75 = vector.extract_strided_slice %50 {offsets = [3, 0], sizes = [16, 16], strides = [1, 1]} : vector<22x16xf32> to vector<16x16xf32>
    %c21_i32 = arith.constant 21 : i32
    %76 = arith.addi %48, %c21_i32 : i32
    %c0_i32_30 = arith.constant 0 : i32
    %77 = arith.addi %76, %c0_i32_30 : i32
    %78 = arith.index_cast %77 : i32 to index
    %79 = memref.load %arg5[%78] : memref<196xf32, #tpu.memory_space<smem>>
    %80 = vector.broadcast %79 : f32 to vector<16x16xf32>
    %81 = arith.mulf %75, %80 : vector<16x16xf32>
    %82 = arith.addf %74, %81 : vector<16x16xf32>
    %83 = vector.extract_strided_slice %50 {offsets = [4, 0], sizes = [16, 16], strides = [1, 1]} : vector<22x16xf32> to vector<16x16xf32>
    %c28_i32 = arith.constant 28 : i32
    %84 = arith.addi %48, %c28_i32 : i32
    %c0_i32_31 = arith.constant 0 : i32
    %85 = arith.addi %84, %c0_i32_31 : i32
    %86 = arith.index_cast %85 : i32 to index
    %87 = memref.load %arg5[%86] : memref<196xf32, #tpu.memory_space<smem>>
    %88 = vector.broadcast %87 : f32 to vector<16x16xf32>
    %89 = arith.mulf %83, %88 : vector<16x16xf32>
    %90 = arith.addf %82, %89 : vector<16x16xf32>
    %91 = vector.extract_strided_slice %50 {offsets = [5, 0], sizes = [16, 16], strides = [1, 1]} : vector<22x16xf32> to vector<16x16xf32>
    %c35_i32 = arith.constant 35 : i32
    %92 = arith.addi %48, %c35_i32 : i32
    %c0_i32_32 = arith.constant 0 : i32
    %93 = arith.addi %92, %c0_i32_32 : i32
    %94 = arith.index_cast %93 : i32 to index
    %95 = memref.load %arg5[%94] : memref<196xf32, #tpu.memory_space<smem>>
    %96 = vector.broadcast %95 : f32 to vector<16x16xf32>
    %97 = arith.mulf %91, %96 : vector<16x16xf32>
    %98 = arith.addf %90, %97 : vector<16x16xf32>
    %99 = vector.extract_strided_slice %50 {offsets = [6, 0], sizes = [16, 16], strides = [1, 1]} : vector<22x16xf32> to vector<16x16xf32>
    %c42_i32 = arith.constant 42 : i32
    %100 = arith.addi %48, %c42_i32 : i32
    %c0_i32_33 = arith.constant 0 : i32
    %101 = arith.addi %100, %c0_i32_33 : i32
    %102 = arith.index_cast %101 : i32 to index
    %103 = memref.load %arg5[%102] : memref<196xf32, #tpu.memory_space<smem>>
    %104 = vector.broadcast %103 : f32 to vector<16x16xf32>
    %105 = arith.mulf %99, %104 : vector<16x16xf32>
    %106 = arith.addf %98, %105 : vector<16x16xf32>
    %c5_34 = arith.constant 5 : index
    %c1_35 = arith.constant 1 : index
    %107 = vector.load %arg8[%c5_34, %c1_35] : memref<27x22xf32, #tpu.memory_space<vmem>>, vector<22x16xf32>
    %108 = vector.extract_strided_slice %107 {offsets = [0, 0], sizes = [16, 16], strides = [1, 1]} : vector<22x16xf32> to vector<16x16xf32>
    %c0_i32_36 = arith.constant 0 : i32
    %109 = arith.addi %48, %c0_i32_36 : i32
    %c1_i32_37 = arith.constant 1 : i32
    %110 = arith.addi %109, %c1_i32_37 : i32
    %111 = arith.index_cast %110 : i32 to index
    %112 = memref.load %arg5[%111] : memref<196xf32, #tpu.memory_space<smem>>
    %113 = vector.broadcast %112 : f32 to vector<16x16xf32>
    %114 = arith.mulf %108, %113 : vector<16x16xf32>
    %115 = arith.addf %106, %114 : vector<16x16xf32>
    %116 = vector.extract_strided_slice %107 {offsets = [1, 0], sizes = [16, 16], strides = [1, 1]} : vector<22x16xf32> to vector<16x16xf32>
    %c7_i32_38 = arith.constant 7 : i32
    %117 = arith.addi %48, %c7_i32_38 : i32
    %c1_i32_39 = arith.constant 1 : i32
    %118 = arith.addi %117, %c1_i32_39 : i32
    %119 = arith.index_cast %118 : i32 to index
    %120 = memref.load %arg5[%119] : memref<196xf32, #tpu.memory_space<smem>>
    %121 = vector.broadcast %120 : f32 to vector<16x16xf32>
    %122 = arith.mulf %116, %121 : vector<16x16xf32>
    %123 = arith.addf %115, %122 : vector<16x16xf32>
    %124 = vector.extract_strided_slice %107 {offsets = [2, 0], sizes = [16, 16], strides = [1, 1]} : vector<22x16xf32> to vector<16x16xf32>
    %c14_i32_40 = arith.constant 14 : i32
    %125 = arith.addi %48, %c14_i32_40 : i32
    %c1_i32_41 = arith.constant 1 : i32
    %126 = arith.addi %125, %c1_i32_41 : i32
    %127 = arith.index_cast %126 : i32 to index
    %128 = memref.load %arg5[%127] : memref<196xf32, #tpu.memory_space<smem>>
    %129 = vector.broadcast %128 : f32 to vector<16x16xf32>
    %130 = arith.mulf %124, %129 : vector<16x16xf32>
    %131 = arith.addf %123, %130 : vector<16x16xf32>
    %132 = vector.extract_strided_slice %107 {offsets = [3, 0], sizes = [16, 16], strides = [1, 1]} : vector<22x16xf32> to vector<16x16xf32>
    %c21_i32_42 = arith.constant 21 : i32
    %133 = arith.addi %48, %c21_i32_42 : i32
    %c1_i32_43 = arith.constant 1 : i32
    %134 = arith.addi %133, %c1_i32_43 : i32
    %135 = arith.index_cast %134 : i32 to index
    %136 = memref.load %arg5[%135] : memref<196xf32, #tpu.memory_space<smem>>
    %137 = vector.broadcast %136 : f32 to vector<16x16xf32>
    %138 = arith.mulf %132, %137 : vector<16x16xf32>
    %139 = arith.addf %131, %138 : vector<16x16xf32>
    %140 = vector.extract_strided_slice %107 {offsets = [4, 0], sizes = [16, 16], strides = [1, 1]} : vector<22x16xf32> to vector<16x16xf32>
    %c28_i32_44 = arith.constant 28 : i32
    %141 = arith.addi %48, %c28_i32_44 : i32
    %c1_i32_45 = arith.constant 1 : i32
    %142 = arith.addi %141, %c1_i32_45 : i32
    %143 = arith.index_cast %142 : i32 to index
    %144 = memref.load %arg5[%143] : memref<196xf32, #tpu.memory_space<smem>>
    %145 = vector.broadcast %144 : f32 to vector<16x16xf32>
    %146 = arith.mulf %140, %145 : vector<16x16xf32>
    %147 = arith.addf %139, %146 : vector<16x16xf32>
    %148 = vector.extract_strided_slice %107 {offsets = [5, 0], sizes = [16, 16], strides = [1, 1]} : vector<22x16xf32> to vector<16x16xf32>
    %c35_i32_46 = arith.constant 35 : i32
    %149 = arith.addi %48, %c35_i32_46 : i32
    %c1_i32_47 = arith.constant 1 : i32
    %150 = arith.addi %149, %c1_i32_47 : i32
    %151 = arith.index_cast %150 : i32 to index
    %152 = memref.load %arg5[%151] : memref<196xf32, #tpu.memory_space<smem>>
    %153 = vector.broadcast %152 : f32 to vector<16x16xf32>
    %154 = arith.mulf %148, %153 : vector<16x16xf32>
    %155 = arith.addf %147, %154 : vector<16x16xf32>
    %156 = vector.extract_strided_slice %107 {offsets = [6, 0], sizes = [16, 16], strides = [1, 1]} : vector<22x16xf32> to vector<16x16xf32>
    %c42_i32_48 = arith.constant 42 : i32
    %157 = arith.addi %48, %c42_i32_48 : i32
    %c1_i32_49 = arith.constant 1 : i32
    %158 = arith.addi %157, %c1_i32_49 : i32
    %159 = arith.index_cast %158 : i32 to index
    %160 = memref.load %arg5[%159] : memref<196xf32, #tpu.memory_space<smem>>
    %161 = vector.broadcast %160 : f32 to vector<16x16xf32>
    %162 = arith.mulf %156, %161 : vector<16x16xf32>
    %163 = arith.addf %155, %162 : vector<16x16xf32>
    %c5_50 = arith.constant 5 : index
    %c2_51 = arith.constant 2 : index
    %164 = vector.load %arg8[%c5_50, %c2_51] : memref<27x22xf32, #tpu.memory_space<vmem>>, vector<22x16xf32>
    %165 = vector.extract_strided_slice %164 {offsets = [0, 0], sizes = [16, 16], strides = [1, 1]} : vector<22x16xf32> to vector<16x16xf32>
    %c0_i32_52 = arith.constant 0 : i32
    %166 = arith.addi %48, %c0_i32_52 : i32
    %c2_i32_53 = arith.constant 2 : i32
    %167 = arith.addi %166, %c2_i32_53 : i32
    %168 = arith.index_cast %167 : i32 to index
    %169 = memref.load %arg5[%168] : memref<196xf32, #tpu.memory_space<smem>>
    %170 = vector.broadcast %169 : f32 to vector<16x16xf32>
    %171 = arith.mulf %165, %170 : vector<16x16xf32>
    %172 = arith.addf %163, %171 : vector<16x16xf32>
    %173 = vector.extract_strided_slice %164 {offsets = [1, 0], sizes = [16, 16], strides = [1, 1]} : vector<22x16xf32> to vector<16x16xf32>
    %c7_i32_54 = arith.constant 7 : i32
    %174 = arith.addi %48, %c7_i32_54 : i32
    %c2_i32_55 = arith.constant 2 : i32
    %175 = arith.addi %174, %c2_i32_55 : i32
    %176 = arith.index_cast %175 : i32 to index
    %177 = memref.load %arg5[%176] : memref<196xf32, #tpu.memory_space<smem>>
    %178 = vector.broadcast %177 : f32 to vector<16x16xf32>
    %179 = arith.mulf %173, %178 : vector<16x16xf32>
    %180 = arith.addf %172, %179 : vector<16x16xf32>
    %181 = vector.extract_strided_slice %164 {offsets = [2, 0], sizes = [16, 16], strides = [1, 1]} : vector<22x16xf32> to vector<16x16xf32>
    %c14_i32_56 = arith.constant 14 : i32
    %182 = arith.addi %48, %c14_i32_56 : i32
    %c2_i32_57 = arith.constant 2 : i32
    %183 = arith.addi %182, %c2_i32_57 : i32
    %184 = arith.index_cast %183 : i32 to index
    %185 = memref.load %arg5[%184] : memref<196xf32, #tpu.memory_space<smem>>
    %186 = vector.broadcast %185 : f32 to vector<16x16xf32>
    %187 = arith.mulf %181, %186 : vector<16x16xf32>
    %188 = arith.addf %180, %187 : vector<16x16xf32>
    %189 = vector.extract_strided_slice %164 {offsets = [3, 0], sizes = [16, 16], strides = [1, 1]} : vector<22x16xf32> to vector<16x16xf32>
    %c21_i32_58 = arith.constant 21 : i32
    %190 = arith.addi %48, %c21_i32_58 : i32
    %c2_i32_59 = arith.constant 2 : i32
    %191 = arith.addi %190, %c2_i32_59 : i32
    %192 = arith.index_cast %191 : i32 to index
    %193 = memref.load %arg5[%192] : memref<196xf32, #tpu.memory_space<smem>>
    %194 = vector.broadcast %193 : f32 to vector<16x16xf32>
    %195 = arith.mulf %189, %194 : vector<16x16xf32>
    %196 = arith.addf %188, %195 : vector<16x16xf32>
    %197 = vector.extract_strided_slice %164 {offsets = [4, 0], sizes = [16, 16], strides = [1, 1]} : vector<22x16xf32> to vector<16x16xf32>
    %c28_i32_60 = arith.constant 28 : i32
    %198 = arith.addi %48, %c28_i32_60 : i32
    %c2_i32_61 = arith.constant 2 : i32
    %199 = arith.addi %198, %c2_i32_61 : i32
    %200 = arith.index_cast %199 : i32 to index
    %201 = memref.load %arg5[%200] : memref<196xf32, #tpu.memory_space<smem>>
    %202 = vector.broadcast %201 : f32 to vector<16x16xf32>
    %203 = arith.mulf %197, %202 : vector<16x16xf32>
    %204 = arith.addf %196, %203 : vector<16x16xf32>
    %205 = vector.extract_strided_slice %164 {offsets = [5, 0], sizes = [16, 16], strides = [1, 1]} : vector<22x16xf32> to vector<16x16xf32>
    %c35_i32_62 = arith.constant 35 : i32
    %206 = arith.addi %48, %c35_i32_62 : i32
    %c2_i32_63 = arith.constant 2 : i32
    %207 = arith.addi %206, %c2_i32_63 : i32
    %208 = arith.index_cast %207 : i32 to index
    %209 = memref.load %arg5[%208] : memref<196xf32, #tpu.memory_space<smem>>
    %210 = vector.broadcast %209 : f32 to vector<16x16xf32>
    %211 = arith.mulf %205, %210 : vector<16x16xf32>
    %212 = arith.addf %204, %211 : vector<16x16xf32>
    %213 = vector.extract_strided_slice %164 {offsets = [6, 0], sizes = [16, 16], strides = [1, 1]} : vector<22x16xf32> to vector<16x16xf32>
    %c42_i32_64 = arith.constant 42 : i32
    %214 = arith.addi %48, %c42_i32_64 : i32
    %c2_i32_65 = arith.constant 2 : i32
    %215 = arith.addi %214, %c2_i32_65 : i32
    %216 = arith.index_cast %215 : i32 to index
    %217 = memref.load %arg5[%216] : memref<196xf32, #tpu.memory_space<smem>>
    %218 = vector.broadcast %217 : f32 to vector<16x16xf32>
    %219 = arith.mulf %213, %218 : vector<16x16xf32>
    %220 = arith.addf %212, %219 : vector<16x16xf32>
    %c5_66 = arith.constant 5 : index
    %c3_67 = arith.constant 3 : index
    %221 = vector.load %arg8[%c5_66, %c3_67] : memref<27x22xf32, #tpu.memory_space<vmem>>, vector<22x16xf32>
    %222 = vector.extract_strided_slice %221 {offsets = [0, 0], sizes = [16, 16], strides = [1, 1]} : vector<22x16xf32> to vector<16x16xf32>
    %c0_i32_68 = arith.constant 0 : i32
    %223 = arith.addi %48, %c0_i32_68 : i32
    %c3_i32_69 = arith.constant 3 : i32
    %224 = arith.addi %223, %c3_i32_69 : i32
    %225 = arith.index_cast %224 : i32 to index
    %226 = memref.load %arg5[%225] : memref<196xf32, #tpu.memory_space<smem>>
    %227 = vector.broadcast %226 : f32 to vector<16x16xf32>
    %228 = arith.mulf %222, %227 : vector<16x16xf32>
    %229 = arith.addf %220, %228 : vector<16x16xf32>
    %230 = vector.extract_strided_slice %221 {offsets = [1, 0], sizes = [16, 16], strides = [1, 1]} : vector<22x16xf32> to vector<16x16xf32>
    %c7_i32_70 = arith.constant 7 : i32
    %231 = arith.addi %48, %c7_i32_70 : i32
    %c3_i32_71 = arith.constant 3 : i32
    %232 = arith.addi %231, %c3_i32_71 : i32
    %233 = arith.index_cast %232 : i32 to index
    %234 = memref.load %arg5[%233] : memref<196xf32, #tpu.memory_space<smem>>
    %235 = vector.broadcast %234 : f32 to vector<16x16xf32>
    %236 = arith.mulf %230, %235 : vector<16x16xf32>
    %237 = arith.addf %229, %236 : vector<16x16xf32>
    %238 = vector.extract_strided_slice %221 {offsets = [2, 0], sizes = [16, 16], strides = [1, 1]} : vector<22x16xf32> to vector<16x16xf32>
    %c14_i32_72 = arith.constant 14 : i32
    %239 = arith.addi %48, %c14_i32_72 : i32
    %c3_i32_73 = arith.constant 3 : i32
    %240 = arith.addi %239, %c3_i32_73 : i32
    %241 = arith.index_cast %240 : i32 to index
    %242 = memref.load %arg5[%241] : memref<196xf32, #tpu.memory_space<smem>>
    %243 = vector.broadcast %242 : f32 to vector<16x16xf32>
    %244 = arith.mulf %238, %243 : vector<16x16xf32>
    %245 = arith.addf %237, %244 : vector<16x16xf32>
    %246 = vector.extract_strided_slice %221 {offsets = [3, 0], sizes = [16, 16], strides = [1, 1]} : vector<22x16xf32> to vector<16x16xf32>
    %c21_i32_74 = arith.constant 21 : i32
    %247 = arith.addi %48, %c21_i32_74 : i32
    %c3_i32_75 = arith.constant 3 : i32
    %248 = arith.addi %247, %c3_i32_75 : i32
    %249 = arith.index_cast %248 : i32 to index
    %250 = memref.load %arg5[%249] : memref<196xf32, #tpu.memory_space<smem>>
    %251 = vector.broadcast %250 : f32 to vector<16x16xf32>
    %252 = arith.mulf %246, %251 : vector<16x16xf32>
    %253 = arith.addf %245, %252 : vector<16x16xf32>
    %254 = vector.extract_strided_slice %221 {offsets = [4, 0], sizes = [16, 16], strides = [1, 1]} : vector<22x16xf32> to vector<16x16xf32>
    %c28_i32_76 = arith.constant 28 : i32
    %255 = arith.addi %48, %c28_i32_76 : i32
    %c3_i32_77 = arith.constant 3 : i32
    %256 = arith.addi %255, %c3_i32_77 : i32
    %257 = arith.index_cast %256 : i32 to index
    %258 = memref.load %arg5[%257] : memref<196xf32, #tpu.memory_space<smem>>
    %259 = vector.broadcast %258 : f32 to vector<16x16xf32>
    %260 = arith.mulf %254, %259 : vector<16x16xf32>
    %261 = arith.addf %253, %260 : vector<16x16xf32>
    %262 = vector.extract_strided_slice %221 {offsets = [5, 0], sizes = [16, 16], strides = [1, 1]} : vector<22x16xf32> to vector<16x16xf32>
    %c35_i32_78 = arith.constant 35 : i32
    %263 = arith.addi %48, %c35_i32_78 : i32
    %c3_i32_79 = arith.constant 3 : i32
    %264 = arith.addi %263, %c3_i32_79 : i32
    %265 = arith.index_cast %264 : i32 to index
    %266 = memref.load %arg5[%265] : memref<196xf32, #tpu.memory_space<smem>>
    %267 = vector.broadcast %266 : f32 to vector<16x16xf32>
    %268 = arith.mulf %262, %267 : vector<16x16xf32>
    %269 = arith.addf %261, %268 : vector<16x16xf32>
    %270 = vector.extract_strided_slice %221 {offsets = [6, 0], sizes = [16, 16], strides = [1, 1]} : vector<22x16xf32> to vector<16x16xf32>
    %c42_i32_80 = arith.constant 42 : i32
    %271 = arith.addi %48, %c42_i32_80 : i32
    %c3_i32_81 = arith.constant 3 : i32
    %272 = arith.addi %271, %c3_i32_81 : i32
    %273 = arith.index_cast %272 : i32 to index
    %274 = memref.load %arg5[%273] : memref<196xf32, #tpu.memory_space<smem>>
    %275 = vector.broadcast %274 : f32 to vector<16x16xf32>
    %276 = arith.mulf %270, %275 : vector<16x16xf32>
    %277 = arith.addf %269, %276 : vector<16x16xf32>
    %c5_82 = arith.constant 5 : index
    %c4 = arith.constant 4 : index
    %278 = vector.load %arg8[%c5_82, %c4] : memref<27x22xf32, #tpu.memory_space<vmem>>, vector<22x16xf32>
    %279 = vector.extract_strided_slice %278 {offsets = [0, 0], sizes = [16, 16], strides = [1, 1]} : vector<22x16xf32> to vector<16x16xf32>
    %c0_i32_83 = arith.constant 0 : i32
    %280 = arith.addi %48, %c0_i32_83 : i32
    %c4_i32_84 = arith.constant 4 : i32
    %281 = arith.addi %280, %c4_i32_84 : i32
    %282 = arith.index_cast %281 : i32 to index
    %283 = memref.load %arg5[%282] : memref<196xf32, #tpu.memory_space<smem>>
    %284 = vector.broadcast %283 : f32 to vector<16x16xf32>
    %285 = arith.mulf %279, %284 : vector<16x16xf32>
    %286 = arith.addf %277, %285 : vector<16x16xf32>
    %287 = vector.extract_strided_slice %278 {offsets = [1, 0], sizes = [16, 16], strides = [1, 1]} : vector<22x16xf32> to vector<16x16xf32>
    %c7_i32_85 = arith.constant 7 : i32
    %288 = arith.addi %48, %c7_i32_85 : i32
    %c4_i32_86 = arith.constant 4 : i32
    %289 = arith.addi %288, %c4_i32_86 : i32
    %290 = arith.index_cast %289 : i32 to index
    %291 = memref.load %arg5[%290] : memref<196xf32, #tpu.memory_space<smem>>
    %292 = vector.broadcast %291 : f32 to vector<16x16xf32>
    %293 = arith.mulf %287, %292 : vector<16x16xf32>
    %294 = arith.addf %286, %293 : vector<16x16xf32>
    %295 = vector.extract_strided_slice %278 {offsets = [2, 0], sizes = [16, 16], strides = [1, 1]} : vector<22x16xf32> to vector<16x16xf32>
    %c14_i32_87 = arith.constant 14 : i32
    %296 = arith.addi %48, %c14_i32_87 : i32
    %c4_i32_88 = arith.constant 4 : i32
    %297 = arith.addi %296, %c4_i32_88 : i32
    %298 = arith.index_cast %297 : i32 to index
    %299 = memref.load %arg5[%298] : memref<196xf32, #tpu.memory_space<smem>>
    %300 = vector.broadcast %299 : f32 to vector<16x16xf32>
    %301 = arith.mulf %295, %300 : vector<16x16xf32>
    %302 = arith.addf %294, %301 : vector<16x16xf32>
    %303 = vector.extract_strided_slice %278 {offsets = [3, 0], sizes = [16, 16], strides = [1, 1]} : vector<22x16xf32> to vector<16x16xf32>
    %c21_i32_89 = arith.constant 21 : i32
    %304 = arith.addi %48, %c21_i32_89 : i32
    %c4_i32_90 = arith.constant 4 : i32
    %305 = arith.addi %304, %c4_i32_90 : i32
    %306 = arith.index_cast %305 : i32 to index
    %307 = memref.load %arg5[%306] : memref<196xf32, #tpu.memory_space<smem>>
    %308 = vector.broadcast %307 : f32 to vector<16x16xf32>
    %309 = arith.mulf %303, %308 : vector<16x16xf32>
    %310 = arith.addf %302, %309 : vector<16x16xf32>
    %311 = vector.extract_strided_slice %278 {offsets = [4, 0], sizes = [16, 16], strides = [1, 1]} : vector<22x16xf32> to vector<16x16xf32>
    %c28_i32_91 = arith.constant 28 : i32
    %312 = arith.addi %48, %c28_i32_91 : i32
    %c4_i32_92 = arith.constant 4 : i32
    %313 = arith.addi %312, %c4_i32_92 : i32
    %314 = arith.index_cast %313 : i32 to index
    %315 = memref.load %arg5[%314] : memref<196xf32, #tpu.memory_space<smem>>
    %316 = vector.broadcast %315 : f32 to vector<16x16xf32>
    %317 = arith.mulf %311, %316 : vector<16x16xf32>
    %318 = arith.addf %310, %317 : vector<16x16xf32>
    %319 = vector.extract_strided_slice %278 {offsets = [5, 0], sizes = [16, 16], strides = [1, 1]} : vector<22x16xf32> to vector<16x16xf32>
    %c35_i32_93 = arith.constant 35 : i32
    %320 = arith.addi %48, %c35_i32_93 : i32
    %c4_i32_94 = arith.constant 4 : i32
    %321 = arith.addi %320, %c4_i32_94 : i32
    %322 = arith.index_cast %321 : i32 to index
    %323 = memref.load %arg5[%322] : memref<196xf32, #tpu.memory_space<smem>>
    %324 = vector.broadcast %323 : f32 to vector<16x16xf32>
    %325 = arith.mulf %319, %324 : vector<16x16xf32>
    %326 = arith.addf %318, %325 : vector<16x16xf32>
    %327 = vector.extract_strided_slice %278 {offsets = [6, 0], sizes = [16, 16], strides = [1, 1]} : vector<22x16xf32> to vector<16x16xf32>
    %c42_i32_95 = arith.constant 42 : i32
    %328 = arith.addi %48, %c42_i32_95 : i32
    %c4_i32_96 = arith.constant 4 : i32
    %329 = arith.addi %328, %c4_i32_96 : i32
    %330 = arith.index_cast %329 : i32 to index
    %331 = memref.load %arg5[%330] : memref<196xf32, #tpu.memory_space<smem>>
    %332 = vector.broadcast %331 : f32 to vector<16x16xf32>
    %333 = arith.mulf %327, %332 : vector<16x16xf32>
    %334 = arith.addf %326, %333 : vector<16x16xf32>
    %c5_97 = arith.constant 5 : index
    %c5_98 = arith.constant 5 : index
    %335 = vector.load %arg8[%c5_97, %c5_98] : memref<27x22xf32, #tpu.memory_space<vmem>>, vector<22x16xf32>
    %336 = vector.extract_strided_slice %335 {offsets = [0, 0], sizes = [16, 16], strides = [1, 1]} : vector<22x16xf32> to vector<16x16xf32>
    %c0_i32_99 = arith.constant 0 : i32
    %337 = arith.addi %48, %c0_i32_99 : i32
    %c5_i32 = arith.constant 5 : i32
    %338 = arith.addi %337, %c5_i32 : i32
    %339 = arith.index_cast %338 : i32 to index
    %340 = memref.load %arg5[%339] : memref<196xf32, #tpu.memory_space<smem>>
    %341 = vector.broadcast %340 : f32 to vector<16x16xf32>
    %342 = arith.mulf %336, %341 : vector<16x16xf32>
    %343 = arith.addf %334, %342 : vector<16x16xf32>
    %344 = vector.extract_strided_slice %335 {offsets = [1, 0], sizes = [16, 16], strides = [1, 1]} : vector<22x16xf32> to vector<16x16xf32>
    %c7_i32_100 = arith.constant 7 : i32
    %345 = arith.addi %48, %c7_i32_100 : i32
    %c5_i32_101 = arith.constant 5 : i32
    %346 = arith.addi %345, %c5_i32_101 : i32
    %347 = arith.index_cast %346 : i32 to index
    %348 = memref.load %arg5[%347] : memref<196xf32, #tpu.memory_space<smem>>
    %349 = vector.broadcast %348 : f32 to vector<16x16xf32>
    %350 = arith.mulf %344, %349 : vector<16x16xf32>
    %351 = arith.addf %343, %350 : vector<16x16xf32>
    %352 = vector.extract_strided_slice %335 {offsets = [2, 0], sizes = [16, 16], strides = [1, 1]} : vector<22x16xf32> to vector<16x16xf32>
    %c14_i32_102 = arith.constant 14 : i32
    %353 = arith.addi %48, %c14_i32_102 : i32
    %c5_i32_103 = arith.constant 5 : i32
    %354 = arith.addi %353, %c5_i32_103 : i32
    %355 = arith.index_cast %354 : i32 to index
    %356 = memref.load %arg5[%355] : memref<196xf32, #tpu.memory_space<smem>>
    %357 = vector.broadcast %356 : f32 to vector<16x16xf32>
    %358 = arith.mulf %352, %357 : vector<16x16xf32>
    %359 = arith.addf %351, %358 : vector<16x16xf32>
    %360 = vector.extract_strided_slice %335 {offsets = [3, 0], sizes = [16, 16], strides = [1, 1]} : vector<22x16xf32> to vector<16x16xf32>
    %c21_i32_104 = arith.constant 21 : i32
    %361 = arith.addi %48, %c21_i32_104 : i32
    %c5_i32_105 = arith.constant 5 : i32
    %362 = arith.addi %361, %c5_i32_105 : i32
    %363 = arith.index_cast %362 : i32 to index
    %364 = memref.load %arg5[%363] : memref<196xf32, #tpu.memory_space<smem>>
    %365 = vector.broadcast %364 : f32 to vector<16x16xf32>
    %366 = arith.mulf %360, %365 : vector<16x16xf32>
    %367 = arith.addf %359, %366 : vector<16x16xf32>
    %368 = vector.extract_strided_slice %335 {offsets = [4, 0], sizes = [16, 16], strides = [1, 1]} : vector<22x16xf32> to vector<16x16xf32>
    %c28_i32_106 = arith.constant 28 : i32
    %369 = arith.addi %48, %c28_i32_106 : i32
    %c5_i32_107 = arith.constant 5 : i32
    %370 = arith.addi %369, %c5_i32_107 : i32
    %371 = arith.index_cast %370 : i32 to index
    %372 = memref.load %arg5[%371] : memref<196xf32, #tpu.memory_space<smem>>
    %373 = vector.broadcast %372 : f32 to vector<16x16xf32>
    %374 = arith.mulf %368, %373 : vector<16x16xf32>
    %375 = arith.addf %367, %374 : vector<16x16xf32>
    %376 = vector.extract_strided_slice %335 {offsets = [5, 0], sizes = [16, 16], strides = [1, 1]} : vector<22x16xf32> to vector<16x16xf32>
    %c35_i32_108 = arith.constant 35 : i32
    %377 = arith.addi %48, %c35_i32_108 : i32
    %c5_i32_109 = arith.constant 5 : i32
    %378 = arith.addi %377, %c5_i32_109 : i32
    %379 = arith.index_cast %378 : i32 to index
    %380 = memref.load %arg5[%379] : memref<196xf32, #tpu.memory_space<smem>>
    %381 = vector.broadcast %380 : f32 to vector<16x16xf32>
    %382 = arith.mulf %376, %381 : vector<16x16xf32>
    %383 = arith.addf %375, %382 : vector<16x16xf32>
    %384 = vector.extract_strided_slice %335 {offsets = [6, 0], sizes = [16, 16], strides = [1, 1]} : vector<22x16xf32> to vector<16x16xf32>
    %c42_i32_110 = arith.constant 42 : i32
    %385 = arith.addi %48, %c42_i32_110 : i32
    %c5_i32_111 = arith.constant 5 : i32
    %386 = arith.addi %385, %c5_i32_111 : i32
    %387 = arith.index_cast %386 : i32 to index
    %388 = memref.load %arg5[%387] : memref<196xf32, #tpu.memory_space<smem>>
    %389 = vector.broadcast %388 : f32 to vector<16x16xf32>
    %390 = arith.mulf %384, %389 : vector<16x16xf32>
    %391 = arith.addf %383, %390 : vector<16x16xf32>
    %c5_112 = arith.constant 5 : index
    %c6 = arith.constant 6 : index
    %392 = vector.load %arg8[%c5_112, %c6] : memref<27x22xf32, #tpu.memory_space<vmem>>, vector<22x16xf32>
    %393 = vector.extract_strided_slice %392 {offsets = [0, 0], sizes = [16, 16], strides = [1, 1]} : vector<22x16xf32> to vector<16x16xf32>
    %c0_i32_113 = arith.constant 0 : i32
    %394 = arith.addi %48, %c0_i32_113 : i32
    %c6_i32 = arith.constant 6 : i32
    %395 = arith.addi %394, %c6_i32 : i32
    %396 = arith.index_cast %395 : i32 to index
    %397 = memref.load %arg5[%396] : memref<196xf32, #tpu.memory_space<smem>>
    %398 = vector.broadcast %397 : f32 to vector<16x16xf32>
    %399 = arith.mulf %393, %398 : vector<16x16xf32>
    %400 = arith.addf %391, %399 : vector<16x16xf32>
    %401 = vector.extract_strided_slice %392 {offsets = [1, 0], sizes = [16, 16], strides = [1, 1]} : vector<22x16xf32> to vector<16x16xf32>
    %c7_i32_114 = arith.constant 7 : i32
    %402 = arith.addi %48, %c7_i32_114 : i32
    %c6_i32_115 = arith.constant 6 : i32
    %403 = arith.addi %402, %c6_i32_115 : i32
    %404 = arith.index_cast %403 : i32 to index
    %405 = memref.load %arg5[%404] : memref<196xf32, #tpu.memory_space<smem>>
    %406 = vector.broadcast %405 : f32 to vector<16x16xf32>
    %407 = arith.mulf %401, %406 : vector<16x16xf32>
    %408 = arith.addf %400, %407 : vector<16x16xf32>
    %409 = vector.extract_strided_slice %392 {offsets = [2, 0], sizes = [16, 16], strides = [1, 1]} : vector<22x16xf32> to vector<16x16xf32>
    %c14_i32_116 = arith.constant 14 : i32
    %410 = arith.addi %48, %c14_i32_116 : i32
    %c6_i32_117 = arith.constant 6 : i32
    %411 = arith.addi %410, %c6_i32_117 : i32
    %412 = arith.index_cast %411 : i32 to index
    %413 = memref.load %arg5[%412] : memref<196xf32, #tpu.memory_space<smem>>
    %414 = vector.broadcast %413 : f32 to vector<16x16xf32>
    %415 = arith.mulf %409, %414 : vector<16x16xf32>
    %416 = arith.addf %408, %415 : vector<16x16xf32>
    %417 = vector.extract_strided_slice %392 {offsets = [3, 0], sizes = [16, 16], strides = [1, 1]} : vector<22x16xf32> to vector<16x16xf32>
    %c21_i32_118 = arith.constant 21 : i32
    %418 = arith.addi %48, %c21_i32_118 : i32
    %c6_i32_119 = arith.constant 6 : i32
    %419 = arith.addi %418, %c6_i32_119 : i32
    %420 = arith.index_cast %419 : i32 to index
    %421 = memref.load %arg5[%420] : memref<196xf32, #tpu.memory_space<smem>>
    %422 = vector.broadcast %421 : f32 to vector<16x16xf32>
    %423 = arith.mulf %417, %422 : vector<16x16xf32>
    %424 = arith.addf %416, %423 : vector<16x16xf32>
    %425 = vector.extract_strided_slice %392 {offsets = [4, 0], sizes = [16, 16], strides = [1, 1]} : vector<22x16xf32> to vector<16x16xf32>
    %c28_i32_120 = arith.constant 28 : i32
    %426 = arith.addi %48, %c28_i32_120 : i32
    %c6_i32_121 = arith.constant 6 : i32
    %427 = arith.addi %426, %c6_i32_121 : i32
    %428 = arith.index_cast %427 : i32 to index
    %429 = memref.load %arg5[%428] : memref<196xf32, #tpu.memory_space<smem>>
    %430 = vector.broadcast %429 : f32 to vector<16x16xf32>
    %431 = arith.mulf %425, %430 : vector<16x16xf32>
    %432 = arith.addf %424, %431 : vector<16x16xf32>
    %433 = vector.extract_strided_slice %392 {offsets = [5, 0], sizes = [16, 16], strides = [1, 1]} : vector<22x16xf32> to vector<16x16xf32>
    %c35_i32_122 = arith.constant 35 : i32
    %434 = arith.addi %48, %c35_i32_122 : i32
    %c6_i32_123 = arith.constant 6 : i32
    %435 = arith.addi %434, %c6_i32_123 : i32
    %436 = arith.index_cast %435 : i32 to index
    %437 = memref.load %arg5[%436] : memref<196xf32, #tpu.memory_space<smem>>
    %438 = vector.broadcast %437 : f32 to vector<16x16xf32>
    %439 = arith.mulf %433, %438 : vector<16x16xf32>
    %440 = arith.addf %432, %439 : vector<16x16xf32>
    %441 = vector.extract_strided_slice %392 {offsets = [6, 0], sizes = [16, 16], strides = [1, 1]} : vector<22x16xf32> to vector<16x16xf32>
    %c42_i32_124 = arith.constant 42 : i32
    %442 = arith.addi %48, %c42_i32_124 : i32
    %c6_i32_125 = arith.constant 6 : i32
    %443 = arith.addi %442, %c6_i32_125 : i32
    %444 = arith.index_cast %443 : i32 to index
    %445 = memref.load %arg5[%444] : memref<196xf32, #tpu.memory_space<smem>>
    %446 = vector.broadcast %445 : f32 to vector<16x16xf32>
    %447 = arith.mulf %441, %446 : vector<16x16xf32>
    %448 = arith.addf %440, %447 : vector<16x16xf32>
    %449 = arith.index_cast %arg1 : i32 to index
    %450 = memref.load %arg6[%449] : memref<4xf32, #tpu.memory_space<smem>>
    %451 = vector.broadcast %450 : f32 to vector<16x16xf32>
    %452 = arith.addf %448, %451 : vector<16x16xf32>
    %453 = arith.negf %452 : vector<16x16xf32>
    %454 = math.exp %453 : vector<16x16xf32>
    %cst_126 = arith.constant 1.000000e+00 : f32
    %455 = vector.broadcast %cst_126 : f32 to vector<16x16xf32>
    %456 = arith.addf %455, %454 : vector<16x16xf32>
    %457 = arith.divf %455, %456 : vector<16x16xf32>
    %c0_127 = arith.constant 0 : index
    %458 = arith.index_cast %arg1 : i32 to index
    %c0_128 = arith.constant 0 : index
    %c0_129 = arith.constant 0 : index
    %459 = vector.load %arg2[%c0_127, %458, %c0_128, %c0_129] : memref<1x4x16x16xf32, #tpu.memory_space<vmem>>, vector<1x1x16x16xf32>
    %460 = vector.shape_cast %459 : vector<1x1x16x16xf32> to vector<16x16xf32>
    %461 = arith.mulf %460, %457 : vector<16x16xf32>
    %c0_130 = arith.constant 0 : index
    %c0_131 = arith.constant 0 : index
    %c0_132 = arith.constant 0 : index
    %c0_133 = arith.constant 0 : index
    %462 = vector.load %arg7[%c0_130, %c0_131, %c0_132, %c0_133] : memref<1x1x16x16xf32, #tpu.memory_space<vmem>>, vector<1x1x16x16xf32>
    %463 = vector.shape_cast %462 : vector<1x1x16x16xf32> to vector<16x16xf32>
    %464 = vector.shape_cast %461 : vector<16x16xf32> to vector<1x1x16x16xf32>
    tpu.vector_store %arg7[%c0_130, %c0_131, %c0_132, %c0_133], %464 {strides = array<i32>} : memref<1x1x16x16xf32, #tpu.memory_space<vmem>>, vector<1x1x16x16xf32>,
    return
  }
  func.func @transform_0(%arg0: i32, %arg1: i32) -> (i32, i32, i32, i32) {
    %c0_i32 = arith.constant 0 : i32
    %c0_i32_0 = arith.constant 0 : i32
    %c0_i32_1 = arith.constant 0 : i32
    %c0_i32_2 = arith.constant 0 : i32
    return %arg0, %c0_i32, %c0_i32_0, %c0_i32_1 : i32, i32, i32, i32
  }
  func.func @transform_1(%arg0: i32, %arg1: i32) -> i32 {
    %c0_i32 = arith.constant 0 : i32
    %c0_i32_0 = arith.constant 0 : i32
    return %c0_i32 : i32
  }
  func.func @transform_2(%arg0: i32, %arg1: i32) -> i32 {
    %c0_i32 = arith.constant 0 : i32
    %c0_i32_0 = arith.constant 0 : i32
    return %c0_i32 : i32
  }
  func.func @transform_3(%arg0: i32, %arg1: i32) -> i32 {
    %c0_i32 = arith.constant 0 : i32
    %c0_i32_0 = arith.constant 0 : i32
    return %c0_i32 : i32
  }
  func.func @transform_4(%arg0: i32, %arg1: i32) -> i32 {
    %c0_i32 = arith.constant 0 : i32
    %c0_i32_0 = arith.constant 0 : i32
    return %c0_i32 : i32
  }
  func.func @transform_5(%arg0: i32, %arg1: i32) -> (i32, i32, i32, i32) {
    %c0_i32 = arith.constant 0 : i32
    %c0_i32_0 = arith.constant 0 : i32
    %c0_i32_1 = arith.constant 0 : i32
    return %arg0, %arg1, %c0_i32, %c0_i32_0 : i32, i32, i32, i32
  }
}

</mosaic_0001>

<bundles_post_ra>
// kernel: tpu_custom_call.1
= control target key start
LH: loop header
LB: loop body
LE: loop exit
PB: predicated region body
PF: predicated region fallthrough
CT: control target
= control target key end

     0   :  { %s2949_s0 = inlined_call_operand.hbm [shape: f32[2,4,16,16], index: 0, kind: input, shape index: {}]   ;;  %s2950_s1 = inlined_call_operand.vmem [shape: f32[16], index: 1, kind: input, shape index: {}]   ;;  %s2951_s2 = inlined_call_operand.hbm [shape: f32[4], index: 2, kind: input, shape index: {}]   ;;  %s2952_s3 = inlined_call_operand.vmem [shape: f32[196], index: 3, kind: input, shape index: {}]   ;;  %s2953_s4 = inlined_call_operand.vmem [shape: f32[4], index: 4, kind: input, shape index: {}]   ;;  %s2954_s5 = inlined_call_operand.hbm [shape: f32[2,4,16,16], index: 5, kind: output, shape index: {}]  }
   0x1   :  { %2971 = sst [smem:[#allocation23_spill]] %s2949_s0 }
   0x2   :  { %2972 = sst [smem:[#allocation24_spill]] %s2950_s1 }
   0x3   :  { %2973 = sst [smem:[#allocation25_spill]] %s2951_s2 }
   0x4   :  { %2974 = sst [smem:[#allocation26_spill]] %s2952_s3 }
   0x5   :  { %2975 = sst [smem:[#allocation27_spill]] %s2953_s4 }
   0x6   :  { %2976 = sst [smem:[#allocation28_spill]] %s2954_s5 }
   0x7   :  { %10 = vsyncpa [#allocation4], 0 }
   0x8   :  { %12 = vsyncpa [#allocation4 + $0x1], 0 }
   0x9   :  { %13 = vsyncpa [#allocation7], 0 }
   0xa   :  { %14 = vsyncpa [#allocation6], 0 }
   0xb   :  { %15 = vsyncpa [#allocation11], 0 }
   0xc   :  { %16 = vsyncpa [#allocation5], 0 }
   0xd   :  { %18 = vsyncpa [#allocation5 + $0x1], 0  ;;  %s2016_s18 = smov 0   ;;  %s2018_s19 = smov 0  }
   0xe   :  { %s2020_s20 = smov 0   ;;  %s2022_s21 = smov 0  }
   0xf   :  { %s2024_s22 = smov 0   ;;  %s2026_s23 = smov 0  }
  0x10   :  { %s2028_s24 = smov 0   ;;  %s2030_s25 = smov 0  }
  0x11   :  { %s2032_s26 = smov 0   ;;  %s2034_s27 = smov 0  }
  0x12   :  { %s2036_s28 = smov 0  }
  0x13 LB: > { %2977 = sst [smem:[#allocation19_spill]] %s1926_s18  ;;  %s1549_s29 = sadd.s32 4294967295, %s1966_s28   ;;  %s1966_s28 = sphi %s2036_s28, %s24_s28   ;;  %s1962_s27 = sphi %s2034_s27, %s3014_s27   ;;  %s1958_s26 = sphi %s2032_s26, %s3006_s26   ;;  %s1954_s25 = sphi %s2030_s25, %s3013_s25   ;;  %s1950_s24 = sphi %s2028_s24, %s3005_s24   ;;  %s1946_s23 = sphi %s2026_s23, %s3012_s23   ;;  %s1942_s22 = sphi %s2024_s22, %s3011_s22   ;;  %s1938_s21 = sphi %s2022_s21, %s3010_s21   ;;  %s1934_s20 = sphi %s2020_s20, %s3009_s20   ;;  %s1930_s19 = sphi %s2018_s19, %s3008_s19   ;;  %s1926_s18 = sphi %s2016_s18, %s3007_s18  }
  0x14   : > { %2978 = sst [smem:[#allocation20_spill]] %s1958_s26  ;;  %s1550_s30 = sadd.s32 4294967294, %s1966_s28  }
  0x15   : > { %p56_p0 = scmp.ne.s32.totalorder %s1942_s22, %s1938_s21  ;;  %p2072_p1 = scmp.eq.s32.totalorder %s1549_s29, 0 }
  0x16   : > { %p165_p2 = scmp.ne.s32.totalorder %s1934_s20, %s1930_s19  ;;  %p166_p3 = scmp.eq.s32.totalorder %s1549_s29, 7 }
  0x17   : > { %s2979_s6 = scalar_select %p2072_p1, 1, 0 }
  0x18   : > { %p2080_p4 = por %p2072_p1, %p56_p0  ;;  %p171_p5 = scmp.ne.s32.totalorder %s1930_s19, %s1926_s18 }
  0x19   : > { %p2086_p6 = por %p166_p3, %p165_p2  ;;  %p172_p7 = scmp.eq.s32.totalorder %s1550_s30, 7 }
  0x1a   : > { %s2980_s7 = scalar_select %p2080_p4, 1, 0 }
  0x1b   : > { %s2981_s8 = scalar_select %p2086_p6, 1, 0 }
  0x1c   : > { %p1551_p8 = scmp.ge.s32.totalorder %s1966_s28, 1  ;;  %p179_p9 = scmp.lt.s32.totalorder %s1966_s28, 9 }
  0x1d   : > { %p2092_p10 = por %p172_p7, %p171_p5  ;;  %s2985_s3 = sld [smem:[#allocation26_spill]] }
  0x1e   : > { %p2096_p11 = pnand %p1551_p8, %p179_p9  ;;  %s2987_s1 = sld [smem:[#allocation24_spill]] }
  0x1f   : > { %s2982_s9 = scalar_select %p2092_p10, 1, 0 }
  0x20   : > { %s2984_s10 = scalar_select %p2096_p11, 1, 0 }
  0x21   : > { %2983 = sst [smem:[#allocation21_spill]] %s2982_s9  ;;  %p1604_p12 = pneg %p2096_p11 }
  0x23   : > { %s212_s13 = sshll.u32 %s2985_s3, 4  ;;  %p2107_p13 = pnand %p1604_p12, %p2072_p1  ;;  %s213_s13 = int_to_ptr.vmem [resolvable:$true] %s212_s13 }
  0x24   : > { %s192_s17 = sshll.u32 %s2987_s1, 4  ;;  %s1750_s21 = scalar_lea.vmem %s213_s13, 32  ;;  %s193_s17 = int_to_ptr.vmem [resolvable:$true] %s192_s17 }
  0x25   : > { %p1751_p0 = scmp.ne.s32.totalorder %s213_s13, %s1750_s21  ;;  %p1752_p2 = pneg %p2107_p13 }
  0x26   : > { %p1758_p7 = scmp.lt.s32.totalorder %s213_s13, %s213_s13  ;;  %p1759_p8 = scmp.lt.s32.totalorder %s1750_s21, %s1750_s21 }
  0x27   : > { %p1753_p3 = pnand %p1752_p2, %p1751_p0 }
  0x28   : > { %p1760_p9 = por %p1759_p8, %p1758_p7 }
  0x29   : > { %p1754_p5 = pneg %p1753_p3 }
  0x2b   : > { %p1761_p12 = pnand %p1760_p9, %p1754_p5 }
  0x2d   : > { %1764 = shalt.err (!%p1761_p12)
}
  0x2e   : > { %s1968_s29 = smov [#allocation10]   ;;  %s1765_s30 = scalar_lea.vmem %s193_s17, 16 }
  0x2f   : > { %1613 = dma.vmem_to_smem (!%p2107_p13), %s213_s13, 32, %s1968_s29, [#allocation11]  }
  0x30   : > { %p1766_p10 = scmp.ne.s32.totalorder %s193_s17, %s1765_s30  ;;  %p1773_p4 = scmp.lt.s32.totalorder %s193_s17, %s193_s17 }
  0x31   : > { %p1774_p11 = scmp.lt.s32.totalorder %s1765_s30, %s1765_s30 }
  0x32   : > { %p1768_p6 = pnand %p1766_p10, %p1752_p2 }
  0x33   : > { %p1775_p0 = por %p1774_p11, %p1773_p4 }
  0x34   : > { %p1769_p1 = pneg %p1768_p6 }
  0x36   : > { %p1776_p3 = pnand %p1775_p0, %p1769_p1 }
  0x38   : > { %1779 = shalt.err (!%p1776_p3)
}
  0x39   : > { %s1969_s11 = smov [#allocation8]   ;;  %s1970_s12 = smov [#allocation9]  }
  0x3a   : > { %1607 = dma.vmem_to_smem (!%p2107_p13), %s193_s17, 16, %s1969_s11, [#allocation7]  }
  0x3b   : > { %s2988_s2 = sld [smem:[#allocation25_spill]] }
  0x3c   : > { %s2989_s4 = sld [smem:[#allocation27_spill]] }
  0x41   : > { %1610 = dma.hbm_to_smem (!%p2107_p13), %s2988_s2, 16, %s1970_s12, [#allocation6]  }
  0x42   : > { %s223_s29 = sshll.u32 %s2989_s4, 4  ;;  %s224_s29 = int_to_ptr.vmem [resolvable:$true] %s223_s29 }
  0x43   : > { %s1791_s30 = scalar_lea.vmem %s224_s29, 16  ;;  %p1799_p10 = scmp.lt.s32.totalorder %s224_s29, %s224_s29 }
  0x44   : > { %p1792_p1 = scmp.ne.s32.totalorder %s224_s29, %s1791_s30  ;;  %p1800_p11 = scmp.lt.s32.totalorder %s1791_s30, %s1791_s30 }
  0x46   : > { %p1794_p4 = pnand %p1792_p1, %p1752_p2  ;;  %p1801_p5 = por %p1800_p11, %p1799_p10 }
  0x48   : > { %p1795_p6 = pneg %p1794_p4 }
  0x4a   : > { %p1802_p7 = pnand %p1801_p5, %p1795_p6 }
  0x4c   : > { %1805 = shalt.err (!%p1802_p7)
}
  0x4d   : > { %s1971_s17 = smov [#allocation12]   ;;  %s33_s11 = sadd.s32 1, %s1958_s26 }
  0x4e   : > { %1616 = dma.vmem_to_smem (!%p2107_p13), %s224_s29, 16, %s1971_s17, [#allocation11]  }
  0x4f   : > { %p34_p2 = scmp.ge.s32.totalorder %s33_s11, 4  ;;  %s36_s12 = sadd.s32 1, %s1962_s27 }
  0x50   : > { %s43_s13 = sadd.s32 1, %s1946_s23  ;;  %p50_p8 = scmp.ne.s32.totalorder %s1946_s23, %s1942_s22 }
  0x51   : > { %s3016_s11 = smov (%p34_p2, %s33_s11), 0  ;;  %s3018_s12 = smov (!%p34_p2, %s36_s12), %s1962_s27 }
  0x52   : > { %2990 = sst [smem:[#allocation22_spill]] %s3016_s11  ;;  %p51_p9 = scmp.eq.s32.totalorder %s1966_s28, 0 }
  0x53   : > { %s151_s14 = ssub.s32 %s1958_s26, %s3016_s11  ;;  %p38_p12 = scmp.ge.s32.totalorder %s3018_s12, 2 }
  0x54   : > { %s155_s15 = sadd.s32 1, %s1934_s20  ;;  %p2151_p0 = por %p51_p9, %p50_p8 }
  0x55   : > { %p1629_p13 = scmp.lt.s32.totalorder %s1966_s28, 8  ;;  %s3020_s12 = smov (%p38_p12, %s3018_s12), 0 }
  0x56   : > { %s234_s21 = sand.u32 1, %s1946_s23   ;;  %s1583_s29 = sshll.u32 %s1962_s27, 10 }
  0x57   : > { %s40_s30 = ssub.s32 %s1962_s27, %s3020_s12  ;;  %s1557_s1 = sshll.u32 %s234_s21, 6 }
  0x58   : > { %p41_p3 = scmp.eq.s32.totalorder %s40_s30, 0  ;;  %s152_s17 = sor.u32 %s151_s14, %s40_s30 }
  0x59   : > { %p153_p1 = scmp.eq.s32.totalorder %s152_s17, 0  ;;  %s2992_s0 = sld [smem:[#allocation23_spill]] }
  0x5a   : > { %s2163_s2 = scalar_select %p41_p3, %s1946_s23, %s43_s13  }
  0x5b   : > { %s2166_s3 = scalar_select %p153_p1, %s1934_s20, %s155_s15  }
  0x5c   : > { %s238_s9 = scalar_lea.vmem [#allocation3], %s1557_s1  ;;  %p2175_p4 = pnand %p1629_p13, %p2151_p0 }
  0x5d   : > { %s245_s18 = sshll.u32 %s238_s9, 4  ;;  %s235_s14 = scalar_lea.sflag [#allocation4], %s234_s21  ;;  %s246_s18 = int_to_ptr.vmem [resolvable:$true] %s245_s18 }
  0x5e   : > { %p1808_p6 = pneg %p2175_p4  ;;  %s1819_s13 = scalar_lea.vmem %s246_s18, 1024 }
  0x5f   : > { %s244_s26 = scalar_lea.hbm %s2992_s0, %s1583_s29  ;;  %p1820_p10 = scmp.ne.s32.totalorder %s246_s18, %s1819_s13 }
  0x60   : > { %s1972_s15 = smov [#allocation3]  }
  0x61   : > { %p1822_p11 = pnand %p1820_p10, %p1808_p6  ;;  %s1824_s4 = sshll.u32 %s1972_s15, 4  ;;  %s1825_s4 = int_to_ptr.vmem [resolvable:$false] %s1824_s4 }
  0x62   : > { %s1826_s1 = scalar_lea.vmem %s1825_s4, 2048  ;;  %p1827_p7 = scmp.lt.s32.totalorder %s246_s18, %s1825_s4 }
  0x63   : > { %p1823_p5 = pneg %p1822_p11  ;;  %p1828_p2 = scmp.lt.s32.totalorder %s1826_s1, %s1819_s13 }
  0x65   : > { %p1829_p8 = por %p1828_p2, %p1827_p7 }
  0x67   : > { %p1830_p9 = pnand %p1829_p8, %p1823_p5 }
  0x69   : > { %1833 = shalt.err (!%p1830_p9)
}
  0x6a   : > { %s1973_s9 = smov 128   ;;  %s1974_s11 = smov 8  }
  0x6b   : > { %1620 = dma.hbm_to_vmem [thread:$0]  (!%p2175_p4), %s244_s26, 1024, %s246_s18, %s235_s14, %s1973_s9, %s1973_s9, %s1974_s11  }
  0x6c   : > { %p2994_p12 = scmp.ne.s32.totalorder %s2984_s10, 0 }
  0x6d   : > { %s259_s16 = sand.u32 (!%p2994_p12), 1, %s1942_s22   ;;  %p2995_p0 = scmp.ne.s32.totalorder (!%p2994_p12), %s2980_s7, 0 }
  0x6e   : > { %257 = sbr.rel (%p2994_p12) target bundleno = 606 (0x25e), region = 40  ;;  %s1561_s21 = sshll.u32 (!%p2994_p12), %s259_s16, 6 }
  0x6f   : > { %s260_s29 = scalar_lea.sflag (!%p2994_p12), [#allocation4], %s259_s16  ;;  %s2186_s30 = scalar_lea.vmem (!%p2994_p12), [#allocation3], %s1561_s21 }
  0x73   : > { %1905 = dma.done.wait (%p2995_p0), %s260_s29, 1024  }
  0x74   : > { %1907 = vsyncadd (%p2995_p0), %s260_s29, 4294966272  ;;  %p2996_p13 = scmp.ne.s32.totalorder %s2979_s6, 0 }
  0x76   : > { %1909 = dma.done.wait (%p2996_p13), [#allocation7], 16  }
  0x77   : > { %1911 = vsyncadd (%p2996_p13), [#allocation7], 4294967280 }
  0x78   : > { %1913 = dma.done.wait (%p2996_p13), [#allocation6], 16  }
  0x79   : > { %1915 = vsyncadd (%p2996_p13), [#allocation6], 4294967280 }
  0x7a   : > { %1917 = dma.done.wait (%p2996_p13), [#allocation11], 48  }
  0x7b   : > { %1919 = vsyncadd (%p2996_p13), [#allocation11], 4294967248 }
  0x7c   : > { %284 = sfence }
  0x7d   : > { %s1567_s5 = sshll.u32 %s1950_s24, 2  ;;  %vm350_vm0 = vcmask 174080   ;;  %v1975_v0 = vmov 0.0   ;;  %vm353_vm1 = vcmask 23552   ;;  %vm356_vm2 = vcmask 179352   ;;  %v307_v1 = vld [vmem:[%s2186_s30] sm:$0xff] }
  0x7e   : > { %s310_s18 = sld [smem:[#allocation8 + %s1567_s5]]  ;;  %s317_s26 = sadd.s32 1, %s1567_s5  ;;  %351 = vst.msk [vmem:[#allocation2 + $0x5] sm:$0x7] %vm350_vm0, %v1975_v0  ;;  %352 = vst.msk [vmem:[#allocation2 + $0x18] sm:$0x7] %vm350_vm0, %v1975_v0 }
  0x7f   : > { %s318_s7 = sld [smem:[#allocation8 + %s317_s26]]  ;;  %s327_s10 = sadd.s32 2, %s1567_s5  ;;  %354 = vst.msk [vmem:[#allocation2 + $0x8] sm:$0xff] %vm353_vm1, %v1975_v0  ;;  %355 = vst.msk [vmem:[#allocation2 + $0x10] sm:$0xff] %vm353_vm1, %v1975_v0  ;;  %v308_v2 = vld [vmem:[%s2186_s30 + $0x8] sm:$0xff]  ;;  %v1568_v3 = vld [vmem:[%s2186_s30 + $0x10] sm:$0xff] }
  0x80   : > { %s328_s6 = sld [smem:[#allocation8 + %s327_s10]]  ;;  %s337_s17 = sadd.s32 3, %s1567_s5  ;;  %357 = vst.msk [vmem:[#allocation2 + $0x8] sm:$0xff] %vm356_vm2, %v1975_v0  ;;  %358 = vst.msk [vmem:[#allocation2 + $0x10] sm:$0xff] %vm356_vm2, %v1975_v0  ;;  %v1569_v4 = vld [vmem:[%s2186_s30 + $0x18] sm:$0xff]  ;;  %v1570_v6 = vld [vmem:[%s2186_s30 + $0x20] sm:$0xff] }
  0x81   : > { %s338_s14 = sld [smem:[#allocation8 + %s337_s17]]  ;;  %v1571_v7 = vld [vmem:[%s2186_s30 + $0x28] sm:$0xff]  ;;  %v1572_v11 = vld [vmem:[%s2186_s30 + $0x30] sm:$0xff]  ;;  %v1573_v12 = vld [vmem:[%s2186_s30 + $0x38] sm:$0xff]  ;;  %s1976_s15 = smov 3   ;;  %vm367_vm3 = vcmask 154648  }
  0x82   : > { %s344_s13 = sld [smem:[#allocation9 + %s1950_s24]]  ;;  %s2215_s4 = smul.u32 49, %s1950_s24  ;;  %vm389_vm4 = vcmask 1046528   ;;  %vm408_vm5 = vcmask 1045504   ;;  %vm427_vm6 = vcmask 1044480   ;;  %vm446_vm7 = vcmask 1043456  }
  0x83   : > { %s1978_s17 = smov 127   ;;  %vm465_vm8 = vcmask 1042432   ;;  %vm484_vm9 = vcmask 1041408   ;;  %vm1398_vm10 = vcmask 130048   ;;  %p3001_p1 = scmp.ne.s32.totalorder %s2981_s8, 0 }
  0x84   : > { %v311_v5 = vstv %s310_s18  ;;  %s641_s1 = sadd.s32 2, %s2215_s4  ;;  %s494_s9 = sadd.s32 1, %s2215_s4 }
  0x85   : > { %v312_v8 = vmul.f32 %v311_v5, %v307_v1  ;;  %v313_v9 = vmul.f32 %v311_v5, %v308_v2  ;;  %v319_v10 = vstv %s318_s7  ;;  %s2219_s11 = sld [smem:[#allocation10 + %s641_s1]]  ;;  %s788_s21 = sadd.s32 3, %s2215_s4 }
  0x86   : > { %v320_v13 = vmul.f32 %v1568_v3, %v319_v10  ;;  %v321_v14 = vmul.f32 %v1569_v4, %v319_v10  ;;  %v329_v15 = vstv %s328_s6  ;;  %s495_s16 = sld [smem:[#allocation10 + %s494_s9]]  ;;  %s935_s5 = sadd.s32 4, %s2215_s4 }
  0x87   : > { %v330_v16 = vmul.f32 %v1570_v6, %v329_v15  ;;  %v331_v17 = vmul.f32 %v1571_v7, %v329_v15  ;;  %v339_v18 = vstv %s338_s14  ;;  %s2222_s29 = sld [smem:[#allocation10 + %s788_s21]]  ;;  %s1082_s26 = sadd.s32 5, %s2215_s4 }
  0x88   : > { %v322_v19 = vadd.f32 %v320_v13, %v312_v8  ;;  %v323_v20 = vadd.f32 %v321_v14, %v313_v9  ;;  %v340_v21 = vmul.f32 %v1572_v11, %v339_v18  ;;  %v341_v22 = vmul.f32 %v1573_v12, %v339_v18  ;;  %s2226_s18 = sld [smem:[#allocation10 + %s935_s5]]  ;;  %s509_s10 = sadd.s32 8, %s2215_s4 }
  0x89   : > { %v345_v25 = vstv %s344_s13  ;;  %s2234_s7 = sld [smem:[#allocation10 + %s1082_s26]]  ;;  %s1977_s6 = smov 126  }
  0x8a   : > { %v332_v23 = vadd.f32 %v330_v16, %v322_v19  ;;  %v333_v24 = vadd.f32 %v331_v17, %v323_v20  ;;  %s1229_s14 = sadd.s32 6, %s2215_s4  ;;  %s510_s13 = sld [smem:[#allocation10 + %s509_s10]] }
  0x8b   : > { %v643_v34 = vstv %s2219_s11  ;;  %s531_s1 = sadd.s32 15, %s2215_s4  ;;  %s1979_s9 = smov 125  }
  0x8c   : > { %v342_v26 = vadd.f32 %v340_v21, %v332_v23  ;;  %v343_v27 = vadd.f32 %v341_v22, %v333_v24  ;;  %v496_v35 = vstv %s495_s16  ;;  %s532_s11 = sld [smem:[#allocation10 + %s531_s1]]  ;;  %s553_s16 = sadd.s32 22, %s2215_s4 }
  0x8d   : > { %v790_v39 = vstv %s2222_s29  ;;  %s2969_s21 = smov 124   ;;  %s554_s29 = sld [smem:[#allocation10 + %s553_s16]] }
  0x8e   : > { %v346_v28 = vadd.f32 %v345_v25, %v342_v26  ;;  %v347_v29 = vadd.f32 %v345_v25, %v343_v27  ;;  %v937_v43 = vstv %s2226_s18  ;;  %s575_s5 = sadd.s32 29, %s2215_s4  ;;  %s2967_s18 = smov 123  }
  0x8f   : > { %v1084_v46 = vstv %s2234_s7  ;;  %s576_s26 = sld [smem:[#allocation10 + %s575_s5]]  ;;  %s597_s7 = sadd.s32 36, %s2215_s4 }
  0x90   : > { %v348_v30 = vmax.f32 %v346_v28, 0.0  ;;  %v349_v31 = vmax.f32 %v347_v29, 0.0  ;;  %v511_v49 = vstv %s510_s13  ;;  %s2965_s10 = smov 122   ;;  %s619_s13 = sadd.s32 43, %s2215_s4 }
  0x91   : > { %s656_s1 = sadd.s32 9, %s2215_s4  ;;  %s678_s16 = sadd.s32 16, %s2215_s4 }
  0x92   : > { %361 = vrot.lane.b32.xlu0 %v348_v30, %s1976_s15  ;;  %v533_v55 = vstv %s532_s11  ;;  %s657_s11 = sld [smem:[#allocation10 + %s656_s1]]  ;;  %s700_s5 = sadd.s32 23, %s2215_s4 }
  0x93   : > { %v555_v62 = vstv %s554_s29  ;;  %s679_s29 = sld [smem:[#allocation10 + %s678_s16]]  ;;  %s766_s1 = sadd.s32 44, %s2215_s4 }
  0x94   : > { %s803_s16 = sadd.s32 10, %s2215_s4  ;;  %s1185_s0 = sadd.s32 40, %s2215_s4 }
  0x95   : > { %v577_v5 = vstv %s576_s26  ;;  %s701_s26 = sld [smem:[#allocation10 + %s700_s5]]  ;;  %s825_s5 = sadd.s32 17, %s2215_s4 }
  0x96   : > { %363 = vrot.lane.b32.xlu0 %v349_v31, %s1976_s15  ;;  %s2245_s15 = sld [smem:[#allocation10 + %s1229_s14]] }
  0x97   : > { %s598_s14 = sld [smem:[#allocation10 + %s597_s7]]  ;;  %s722_s7 = sadd.s32 30, %s2215_s4 }
  0x9c   : > { %v1231_v50 = vstv %s2245_s15  ;;  %s620_s15 = sld [smem:[#allocation10 + %s619_s13]]  ;;  %s744_s13 = sadd.s32 37, %s2215_s4 }
  0x9d   : > { %v599_v14 = vstv %s598_s14  ;;  %s723_s14 = sld [smem:[#allocation10 + %s722_s7]] }
  0xa2   : > { %v621_v25 = vstv %s620_s15  ;;  %s745_s15 = sld [smem:[#allocation10 + %s744_s13]] }
 0x104   : > { %v362_v32 = vpop.permute.xlu0 %361 }
 0x105   : > { %368 = vst.msk [vmem:[#allocation2 + $0x8] sm:$0xff] %vm367_vm3, %v362_v32  ;;  %v658_v32 = vstv %s657_s11  ;;  %s767_s11 = sld [smem:[#allocation10 + %s766_s1]] }
 0x108   : > { %v364_v33 = vpop.permute.xlu0 %363 }
 0x109   : > { %369 = vst.msk [vmem:[#allocation2 + $0x10] sm:$0xff] %vm367_vm3, %v364_v33 }
 0x10c   : > { %v2229_v36 = vld [vmem:[#allocation2 + $0x5] sm:$0xff] }
 0x10d   : > { %v644_v37 = vmul.f32 %v643_v34, %v2229_v36  ;;  %v497_v38 = vmul.f32 %v496_v35, %v2229_v36  ;;  %v791_v42 = vmul.f32 %v790_v39, %v2229_v36  ;;  %v938_v44 = vmul.f32 %v937_v43, %v2229_v36 }
 0x10e   : > { %v1085_v47 = vmul.f32 %v1084_v46, %v2229_v36  ;;  %v512_v52 = vmul.f32 %v511_v49, %v2229_v36  ;;  %v1232_v53 = vmul.f32 %v1231_v50, %v2229_v36  ;;  %v534_v60 = vmul.f32 %v533_v55, %v2229_v36 }
 0x10f   : > { %648 = vrot.lane.b32.xlu0 %v644_v37, %s1977_s6  ;;  %501 = vrot.lane.b32.xlu1 %v497_v38, %s1978_s17  ;;  %v556_v4 = vmul.f32 %v555_v62, %v2229_v36  ;;  %v578_v12 = vmul.f32 %v577_v5, %v2229_v36  ;;  %v600_v22 = vmul.f32 %v599_v14, %v2229_v36 }
 0x110   : > { %v2240_v40 = vld [vmem:[#allocation2 + $0xd] sm:$0xff]  ;;  %v2268_v58 = vld [vmem:[#allocation2 + $0x15] sm:$0x3f]  ;;  %v518_v59 = vrot.slane %v512_v52, 1  ;;  %v540_v3 = vrot.slane %v534_v60, 2  ;;  %v622_v31 = vmul.f32 %v621_v25, %v2229_v36  ;;  %v702_v52 = vstv %s701_s26  ;;  %s847_s26 = sadd.s32 24, %s2215_s4 }
 0x111   : > { %v498_v41 = vmul.f32 %v496_v35, %v2240_v40  ;;  %v645_v45 = vmul.f32 %v643_v34, %v2240_v40  ;;  %v792_v48 = vmul.f32 %v790_v39, %v2240_v40  ;;  %v513_v51 = vmul.f32 %v511_v49, %v2240_v40  ;;  %s848_s7 = sld [smem:[#allocation10 + %s847_s26]]  ;;  %s994_s26 = sadd.s32 25, %s2215_s4 }
 0x112   : > { %v939_v54 = vmul.f32 %v937_v43, %v2240_v40  ;;  %v535_v57 = vmul.f32 %v533_v55, %v2240_v40  ;;  %v1086_v61 = vmul.f32 %v1084_v46, %v2240_v40  ;;  %v557_v1 = vmul.f32 %v555_v62, %v2240_v40 }
 0x113   : > { %795 = vrot.lane.b32.xlu0 %v791_v42, %s1979_s9  ;;  %503 = vrot.lane.b32.xlu1 %v498_v41, %s1978_s17  ;;  %v519_v56 = vrot.slane %v513_v51, 1  ;;  %v514_v2 = vmul.f32 %v511_v49, %v2268_v58  ;;  %v1233_v6 = vmul.f32 %v1231_v50, %v2240_v40  ;;  %v579_v7 = vmul.f32 %v577_v5, %v2240_v40 }
 0x114   : > { %v541_v0 = vrot.slane %v535_v57, 2  ;;  %v563_v9 = vrot.slane %v557_v1, 3  ;;  %v536_v11 = vmul.f32 %v533_v55, %v2268_v58  ;;  %v562_v13 = vrot.slane %v556_v4, 3 }
 0x115   : > { %v520_v63 = vsel %vm389_vm4, %v518_v59, %v519_v56  ;;  %v521_v10 = vrot.slane %v514_v2, 1  ;;  %v585_v15 = vrot.slane %v579_v7, 4  ;;  %v601_v16 = vmul.f32 %v599_v14, %v2240_v40 }
 0x116   : > { %v542_v8 = vsel %vm408_vm5, %v540_v3, %v541_v0  ;;  %v564_v17 = vsel %vm427_vm6, %v562_v13, %v563_v9  ;;  %v543_v19 = vrot.slane %v536_v11, 2  ;;  %v558_v20 = vmul.f32 %v555_v62, %v2268_v58 }
 0x117   : > { %942 = vrot.lane.b32.xlu0 %v938_v44, %s2969_s21  ;;  %650 = vrot.lane.b32.xlu1 %v645_v45, %s1977_s6  ;;  %v522_v18 = vsel %vm389_vm4, %v519_v56, %v521_v10  ;;  %v584_v21 = vrot.slane %v578_v12, 4  ;;  %v607_v24 = vrot.slane %v601_v16, 5  ;;  %v623_v28 = vmul.f32 %v621_v25, %v2240_v40 }
 0x118   : > { %v544_v26 = vsel %vm408_vm5, %v541_v0, %v543_v19  ;;  %v565_v27 = vrot.slane %v558_v20, 3  ;;  %v580_v29 = vmul.f32 %v577_v5, %v2268_v58  ;;  %v606_v30 = vrot.slane %v600_v22, 5 }
 0x119   : > { %v586_v23 = vsel %vm446_vm7, %v584_v21, %v585_v15  ;;  %v660_v34 = vmul.f32 %v658_v32, %v2240_v40  ;;  %v629_v37 = vrot.slane %v623_v28, 6  ;;  %v602_v39 = vmul.f32 %v599_v14, %v2268_v58 }
 0x11a   : > { %v608_v33 = vsel %vm465_vm8, %v606_v30, %v607_v24  ;;  %v566_v35 = vsel %vm427_vm6, %v563_v9, %v565_v27  ;;  %v587_v38 = vrot.slane %v580_v29, 4  ;;  %v628_v41 = vrot.slane %v622_v31, 6 }
 0x11b   : > { %1089 = vrot.lane.b32.xlu0 %v1085_v47, %s2967_s18  ;;  %797 = vrot.lane.b32.xlu1 %v792_v48, %s1979_s9  ;;  %v659_v42 = vmul.f32 %v658_v32, %v2229_v36  ;;  %v680_v43 = vstv %s679_s29  ;;  %v666_v44 = vrot.slane %v660_v34, 1  ;;  %v609_v48 = vrot.slane %v602_v39, 5  ;;  %s804_s29 = sld [smem:[#allocation10 + %s803_s16]] }
 0x11c   : > { %v682_v45 = vmul.f32 %v680_v43, %v2240_v40  ;;  %v630_v46 = vsel %vm484_vm9, %v628_v41, %v629_v37  ;;  %v588_v47 = vsel %vm446_vm7, %v585_v15, %v587_v38  ;;  %v624_v49 = vmul.f32 %v621_v25, %v2268_v58 }
 0x11d   : > { %v681_v50 = vmul.f32 %v680_v43, %v2229_v36  ;;  %v665_v51 = vrot.slane %v659_v42, 1  ;;  %v610_v56 = vsel %vm465_vm8, %v607_v24, %v609_v48  ;;  %v661_v59 = vmul.f32 %v658_v32, %v2268_v58 }
 0x11e   : > { %v631_v57 = vrot.slane %v624_v49, 6  ;;  %v724_v0 = vstv %s723_s14  ;;  %v683_v4 = vmul.f32 %v680_v43, %v2268_v58  ;;  %v746_v7 = vstv %s745_s15  ;;  %s869_s14 = sadd.s32 31, %s2215_s4  ;;  %s891_s15 = sadd.s32 38, %s2215_s4 }
 0x11f   : > { %1236 = vrot.lane.b32.xlu0 %v1232_v53, %s2965_s10  ;;  %944 = vrot.lane.b32.xlu1 %v939_v54, %s2969_s21  ;;  %v688_v53 = vrot.slane %v682_v45, 2  ;;  %v704_v54 = vmul.f32 %v702_v52, %v2240_v40  ;;  %v667_v55 = vsel %vm389_vm4, %v665_v51, %v666_v44  ;;  %v687_v60 = vrot.slane %v681_v50, 2  ;;  %s870_s13 = sld [smem:[#allocation10 + %s869_s14]]  ;;  %s1016_s14 = sadd.s32 32, %s2215_s4 }
 0x120   : > { %v632_v1 = vsel %vm484_vm9, %v629_v37, %v631_v57  ;;  %v668_v2 = vrot.slane %v661_v59, 1  ;;  %v726_v3 = vmul.f32 %v724_v0, %v2240_v40  ;;  %v748_v9 = vmul.f32 %v746_v7, %v2240_v40  ;;  %s892_s1 = sld [smem:[#allocation10 + %s891_s15]]  ;;  %s1038_s15 = sadd.s32 39, %s2215_s4 }
 0x121   : > { %v689_v62 = vsel %vm408_vm5, %v687_v60, %v688_v53  ;;  %v690_v12 = vrot.slane %v683_v4, 2  ;;  %v705_v13 = vmul.f32 %v702_v52, %v2268_v58  ;;  %v747_v14 = vmul.f32 %v746_v7, %v2229_v36 }
 0x122   : > { %v669_v10 = vsel %vm389_vm4, %v666_v44, %v668_v2  ;;  %v732_v11 = vrot.slane %v726_v3, 4  ;;  %v768_v16 = vstv %s767_s11  ;;  %v727_v22 = vmul.f32 %v724_v0, %v2268_v58  ;;  %s913_s11 = sadd.s32 45, %s2215_s4 }
 0x123   : > { %523 = vrot.lane.b32.xlu0 %v520_v63, %s1978_s17  ;;  %1091 = vrot.lane.b32.xlu1 %v1086_v61, %s2967_s18  ;;  %v703_v61 = vmul.f32 %v702_v52, %v2229_v36  ;;  %v710_v63 = vrot.slane %v704_v54, 3  ;;  %v691_v20 = vsel %vm408_vm5, %v688_v53, %v690_v12  ;;  %v712_v21 = vrot.slane %v705_v13, 3  ;;  %s914_s16 = sld [smem:[#allocation10 + %s913_s11]]  ;;  %s1119_s18 = sadd.s32 19, %s2215_s4 }
 0x124   : > { %v769_v24 = vmul.f32 %v768_v16, %v2229_v36  ;;  %v805_v27 = vstv %s804_s29  ;;  %v734_v29 = vrot.slane %v727_v22, 4  ;;  %v749_v31 = vmul.f32 %v746_v7, %v2268_v58  ;;  %s950_s29 = sadd.s32 11, %s2215_s4  ;;  %s2428_s11 = sld [smem:[#allocation10 + %s1038_s15]] }
 0x125   : > { %v709_v5 = vrot.slane %v703_v61, 3  ;;  %v713_v28 = vsel %vm427_vm6, %v710_v63, %v712_v21  ;;  %v807_v30 = vmul.f32 %v805_v27, %v2240_v40  ;;  %v771_v42 = vmul.f32 %v768_v16, %v2268_v58  ;;  %s1097_s15 = sadd.s32 12, %s2215_s4 }
 0x126   : > { %v775_v32 = vrot.slane %v769_v24, 6  ;;  %v735_v38 = vsel %vm446_vm7, %v732_v11, %v734_v29  ;;  %v756_v41 = vrot.slane %v749_v31, 5  ;;  %v849_v45 = vstv %s848_s7  ;;  %s995_s7 = sld [smem:[#allocation10 + %s994_s26]] }
 0x127   : > { %545 = vrot.lane.b32.xlu0 %v542_v8, %s1978_s17  ;;  %1238 = vrot.lane.b32.xlu1 %v1233_v6, %s2965_s10  ;;  %v725_v6 = vmul.f32 %v724_v0, %v2229_v36  ;;  %v711_v8 = vsel %vm427_vm6, %v709_v5, %v710_v63  ;;  %v813_v39 = vrot.slane %v807_v30, 1  ;;  %v778_v50 = vrot.slane %v771_v42, 6  ;;  %s2472_s10 = sld [smem:[#allocation10 + %s1097_s15]] }
 0x128   : > { %v808_v51 = vmul.f32 %v805_v27, %v2268_v58  ;;  %v850_v53 = vmul.f32 %v849_v45, %v2229_v36  ;;  %v893_v0 = vstv %s892_s1  ;;  %s1060_s1 = sadd.s32 46, %s2215_s4  ;;  %s2490_s15 = sld [smem:[#allocation10 + %s1119_s18]] }
 0x129   : > { %v731_v15 = vrot.slane %v725_v6, 4  ;;  %v895_v2 = vmul.f32 %v893_v0, %v2240_v40  ;;  %v852_v6 = vmul.f32 %v849_v45, %v2268_v58  ;;  %v894_v7 = vmul.f32 %v893_v0, %v2229_v36  ;;  %s1244_s18 = sadd.s32 13, %s2215_s4 }
 0x12a   : > { %v815_v59 = vrot.slane %v808_v51, 1  ;;  %v896_v24 = vmul.f32 %v893_v0, %v2268_v58 }
 0x12b   : > { %567 = vrot.lane.b32.xlu0 %v564_v17, %s1978_s17  ;;  %525 = vrot.lane.b32.xlu1 %v522_v18, %s1978_s17  ;;  %v754_v17 = vrot.slane %v748_v9, 5  ;;  %v770_v18 = vmul.f32 %v768_v16, %v2240_v40  ;;  %v733_v19 = vsel %vm446_vm7, %v731_v15, %v732_v11  ;;  %v915_v9 = vstv %s914_s16  ;;  %s380_s16 = sadd.s32 7, %s2215_s4 }
 0x12c   : > { %v816_v3 = vsel %vm389_vm4, %v813_v39, %v815_v59  ;;  %v2394_v11 = vmul.f32 %v915_v9, %v2240_v40  ;;  %v900_v16 = vrot.slane %v894_v7, 5  ;;  %s2448_s26 = sld [smem:[#allocation10 + %s380_s16]]  ;;  %s456_s16 = sadd.s32 35, %s2215_s4 }
 0x12d   : > { %v757_v49 = vsel %vm465_vm8, %v754_v17, %v756_v41 }
 0x12f   : > { %589 = vrot.lane.b32.xlu0 %v586_v23, %s1978_s17  ;;  %547 = vrot.lane.b32.xlu1 %v544_v26, %s1978_s17  ;;  %v753_v23 = vrot.slane %v747_v14, 5  ;;  %v776_v26 = vrot.slane %v770_v18, 6  ;;  %v859_v14 = vrot.slane %v852_v6, 3 }
 0x131   : > { %v755_v25 = vsel %vm465_vm8, %v753_v23, %v754_v17  ;;  %v779_v57 = vsel %vm484_vm9, %v776_v26, %v778_v50  ;;  %v916_v17 = vmul.f32 %v915_v9, %v2229_v36 }
 0x133   : > { %611 = vrot.lane.b32.xlu0 %v608_v33, %s1978_s17  ;;  %569 = vrot.lane.b32.xlu1 %v566_v35, %s1978_s17  ;;  %v806_v33 = vmul.f32 %v805_v27, %v2229_v36  ;;  %v777_v35 = vsel %vm484_vm9, %v775_v32, %v776_v26  ;;  %v903_v32 = vrot.slane %v896_v24, 5 }
 0x135   : > { %v812_v44 = vrot.slane %v806_v33, 1  ;;  %v918_v33 = vmul.f32 %v915_v9, %v2268_v58 }
 0x137   : > { %633 = vrot.lane.b32.xlu0 %v630_v46, %s1978_s17  ;;  %591 = vrot.lane.b32.xlu1 %v588_v47, %s1978_s17  ;;  %v851_v47 = vmul.f32 %v849_v45, %v2240_v40  ;;  %v814_v48 = vsel %vm389_vm4, %v812_v44, %v813_v39 }
 0x13b   : > { %670 = vrot.lane.b32.xlu0 %v667_v55, %s1977_s6  ;;  %613 = vrot.lane.b32.xlu1 %v610_v56, %s1978_s17  ;;  %v857_v55 = vrot.slane %v851_v47, 3  ;;  %v871_v56 = vstv %s870_s13  ;;  %s2418_s13 = sld [smem:[#allocation10 + %s1016_s14]] }
 0x13c   : > { %v873_v60 = vmul.f32 %v871_v56, %v2240_v40  ;;  %v872_v63 = vmul.f32 %v871_v56, %v2229_v36  ;;  %v874_v15 = vmul.f32 %v871_v56, %v2268_v58  ;;  %v1040_v56 = vstv %s2428_s11 }
 0x13d   : > { %v860_v21 = vsel %vm427_vm6, %v857_v55, %v859_v14  ;;  %v2477_v59 = vmul.f32 %v1040_v56, %v2240_v40  ;;  %v382_v14 = vstv %s2448_s26 }
 0x13e   : > { %v879_v4 = vrot.slane %v873_v60, 4  ;;  %v881_v22 = vrot.slane %v874_v15, 4 }
 0x13f   : > { %692 = vrot.lane.b32.xlu0 %v689_v62, %s1977_s6  ;;  %635 = vrot.lane.b32.xlu1 %v632_v1, %s1978_s17  ;;  %s826_s17 = sld [smem:[#allocation10 + %s825_s5]]  ;;  %v856_v62 = vrot.slane %v850_v53, 3 }
 0x140   : > { %s951_s5 = sld [smem:[#allocation10 + %s950_s29]]  ;;  %v882_v30 = vsel %vm446_vm7, %v879_v4, %v881_v22 }
 0x141   : > { %v858_v1 = vsel %vm427_vm6, %v856_v62, %v857_v55  ;;  %s2438_s29 = sld [smem:[#allocation10 + %s1060_s1]] }
 0x143   : > { %714 = vrot.lane.b32.xlu0 %v711_v8, %s1977_s6  ;;  %672 = vrot.lane.b32.xlu1 %v669_v10, %s1977_s6  ;;  %v878_v8 = vrot.slane %v872_v63, 4  ;;  %v901_v10 = vrot.slane %v895_v2, 5 }
 0x145   : > { %v827_v34 = vstv %s826_s17  ;;  %s972_s17 = sadd.s32 18, %s2215_s4  ;;  %v880_v12 = vsel %vm446_vm7, %v878_v8, %v879_v4  ;;  %v902_v18 = vsel %vm465_vm8, %v900_v16, %v901_v10  ;;  %v904_v42 = vsel %vm465_vm8, %v901_v10, %v903_v32 }
 0x146   : > { %v829_v37 = vmul.f32 %v827_v34, %v2240_v40  ;;  %v828_v43 = vmul.f32 %v827_v34, %v2229_v36  ;;  %v830_v61 = vmul.f32 %v827_v34, %v2268_v58 }
 0x147   : > { %736 = vrot.lane.b32.xlu0 %v733_v19, %s1977_s6  ;;  %694 = vrot.lane.b32.xlu1 %v691_v20, %s1977_s6  ;;  %v923_v19 = vrot.slane %v2394_v11, 6  ;;  %v952_v20 = vstv %s951_s5  ;;  %s399_s5 = sadd.s32 14, %s2215_s4  ;;  %v1062_v2 = vstv %s2438_s29  ;;  %s2997_s29 = smov 124  }
 0x148   : > { %v835_v46 = vrot.slane %v829_v37, 2  ;;  %v834_v52 = vrot.slane %v828_v43, 2  ;;  %v837_v5 = vrot.slane %v830_v61, 2  ;;  %v2407_v23 = vmul.f32 %v952_v20, %v2240_v40  ;;  %s2454_s14 = sld [smem:[#allocation10 + %s399_s5]]  ;;  %s475_s5 = sadd.s32 42, %s2215_s4 }
 0x149   : > { %v953_v26 = vmul.f32 %v952_v20, %v2229_v36  ;;  %v996_v37 = vstv %s995_s7  ;;  %v925_v43 = vrot.slane %v918_v33, 6  ;;  %v955_v44 = vmul.f32 %v952_v20, %v2268_v58  ;;  %s437_s7 = sadd.s32 28, %s2215_s4  ;;  %s2485_s11 = sld [smem:[#allocation10 + %s475_s5]] }
 0x14a   : > { %v836_v54 = vsel %vm408_vm5, %v834_v52, %v835_v46  ;;  %v838_v13 = vsel %vm408_vm5, %v835_v46, %v837_v5  ;;  %v960_v31 = vrot.slane %v2407_v23, 1  ;;  %v2432_v39 = vmul.f32 %v996_v37, %v2240_v40 }
 0x14b   : > { %758 = vrot.lane.b32.xlu0 %v755_v25, %s1977_s6  ;;  %716 = vrot.lane.b32.xlu1 %v713_v28, %s1977_s6  ;;  %v922_v25 = vrot.slane %v916_v17, 6  ;;  %v997_v46 = vmul.f32 %v996_v37, %v2229_v36  ;;  %v926_v50 = vsel %vm484_vm9, %v923_v19, %v925_v43  ;;  %v962_v51 = vrot.slane %v955_v44, 1 }
 0x14c   : > { %v999_v63 = vmul.f32 %v996_v37, %v2268_v58  ;;  %v2499_v4 = vmul.f32 %v1062_v2, %v2240_v40  ;;  %v1063_v9 = vmul.f32 %v1062_v2, %v2229_v36  ;;  %v1043_v20 = vmul.f32 %v1040_v56, %v2268_v58 }
 0x14d   : > { %v924_v28 = vsel %vm484_vm9, %v922_v25, %v923_v19  ;;  %v963_v60 = vsel %vm389_vm4, %v960_v31, %v962_v51  ;;  %v1065_v37 = vmul.f32 %v1062_v2, %v2268_v58 }
 0x14e   : > { %v1006_v7 = vrot.slane %v999_v63, 3  ;;  %v2520_v15 = vstv %s2454_s14  ;;  %s1288_s14 = sadd.s32 27, %s2215_s4 }
 0x14f   : > { %780 = vrot.lane.b32.xlu0 %v777_v35, %s1977_s6  ;;  %738 = vrot.lane.b32.xlu1 %v735_v38, %s1977_s6  ;;  %v959_v35 = vrot.slane %v953_v26, 1  ;;  %v2543_v26 = vstv %s2485_s11  ;;  %v2574_v43 = vmul.f32 %v2520_v15, %v2240_v40 }
 0x151   : > { %v961_v41 = vsel %vm389_vm4, %v959_v35, %v960_v31 }
 0x153   : > { %817 = vrot.lane.b32.xlu0 %v814_v48, %s1979_s9  ;;  %760 = vrot.lane.b32.xlu1 %v757_v49, %s1977_s6  ;;  %v1004_v48 = vrot.slane %v2432_v39, 3  ;;  %v1018_v49 = vstv %s2418_s13  ;;  %s2467_s13 = sld [smem:[#allocation10 + %s437_s7]]  ;;  %s1163_s7 = sadd.s32 33, %s2215_s4  ;;  %v402_v39 = vmul.f32 %v2520_v15, %v2229_v36 }
 0x154   : > { %v2459_v52 = vmul.f32 %v1018_v49, %v2240_v40  ;;  %v1019_v55 = vmul.f32 %v1018_v49, %v2229_v36  ;;  %s2501_s5 = sld [smem:[#allocation10 + %s1163_s7]]  ;;  %v1021_v8 = vmul.f32 %v1018_v49, %v2268_v58 }
 0x156   : > { %v1026_v61 = vrot.slane %v2459_v52, 4  ;;  %v1025_v0 = vrot.slane %v1019_v55, 4  ;;  %v1028_v19 = vrot.slane %v1021_v8, 4  ;;  %v1072_v55 = vrot.slane %v1065_v37, 6 }
 0x157   : > { %839 = vrot.lane.b32.xlu0 %v836_v54, %s1979_s9  ;;  %782 = vrot.lane.b32.xlu1 %v779_v57, %s1977_s6  ;;  %s973_s6 = sld [smem:[#allocation10 + %s972_s17]]  ;;  %v1003_v54 = vrot.slane %v997_v46, 3 }
 0x158   : > { %s2445_s17 = sld [smem:[#allocation10 + %s2215_s4]]  ;;  %v1027_v5 = vsel %vm446_vm7, %v1025_v0, %v1026_v61  ;;  %v1029_v33 = vsel %vm446_vm7, %v1026_v61, %v1028_v19 }
 0x159   : > { %v1005_v57 = vsel %vm427_vm6, %v1003_v54, %v1004_v48  ;;  %v2536_v23 = vstv %s2467_s13 }
 0x15a   : > { %v2557_v32 = vstv %s2501_s5  ;;  %s1376_s5 = sld [smem:[#allocation12 + %s1950_s24]] }
 0x15b   : > { %861 = vrot.lane.b32.xlu0 %v858_v1, %s1979_s9  ;;  %819 = vrot.lane.b32.xlu1 %v816_v3, %s1979_s9  ;;  %v1041_v1 = vmul.f32 %v1040_v56, %v2229_v36  ;;  %v1048_v3 = vrot.slane %v2477_v59, 5  ;;  %v2626_v8 = vmul.f32 %v2557_v32, %v2240_v40 }
 0x15d   : > { %v974_v27 = vstv %s973_s6  ;;  %s418_s6 = sadd.s32 21, %s2215_s4  ;;  %v1047_v10 = vrot.slane %v1041_v1, 5 }
 0x15e   : > { %v2416_v29 = vmul.f32 %v974_v27, %v2240_v40  ;;  %v975_v34 = vmul.f32 %v974_v27, %v2229_v36  ;;  %v977_v53 = vmul.f32 %v974_v27, %v2268_v58  ;;  %s2462_s1 = sld [smem:[#allocation10 + %s418_s6]]  ;;  %v375_v11 = vstv %s2445_s17  ;;  %s1310_s17 = sadd.s32 34, %s2215_s4 }
 0x15f   : > { %883 = vrot.lane.b32.xlu0 %v880_v12, %s1979_s9  ;;  %841 = vrot.lane.b32.xlu1 %v838_v13, %s1979_s9  ;;  %s2479_s6 = sld [smem:[#allocation10 + %s456_s16]]  ;;  %v1099_v12 = vstv %s2472_s10  ;;  %v1070_v13 = vrot.slane %v2499_v4, 6  ;;  %v1049_v17 = vsel %vm465_vm8, %v1047_v10, %v1048_v3  ;;  %v1121_v27 = vstv %s2490_s15  ;;  %s1266_s10 = sadd.s32 20, %s2215_s4 }
 0x160   : > { %v982_v38 = vrot.slane %v2416_v29, 2  ;;  %v981_v45 = vrot.slane %v975_v34, 2  ;;  %v984_v62 = vrot.slane %v977_v53, 2  ;;  %v2523_v16 = vmul.f32 %v1099_v12, %v2240_v40  ;;  %s2686_s26 = sld [smem:[#allocation10 + %s1266_s10]]  ;;  %s1354_s15 = sadd.s32 48, %s2215_s4 }
 0x161   : > { %v1100_v24 = vmul.f32 %v1099_v12, %v2229_v36  ;;  %v1050_v34 = vrot.slane %v1043_v20, 5  ;;  %v2561_v35 = vmul.f32 %v1121_v27, %v2240_v40  ;;  %v1102_v56 = vmul.f32 %v1099_v12, %v2268_v58  ;;  %s2740_s13 = sld [smem:[#allocation10 + %s1310_s17]] }
 0x162   : > { %v983_v47 = vsel %vm408_vm5, %v981_v45, %v982_v38  ;;  %v985_v6 = vsel %vm408_vm5, %v982_v38, %v984_v62  ;;  %v1107_v31 = vrot.slane %v2523_v16, 1  ;;  %v383_v38 = vmul.f32 %v382_v14, %v2229_v36 }
 0x163   : > { %905 = vrot.lane.b32.xlu0 %v902_v18, %s1979_s9  ;;  %863 = vrot.lane.b32.xlu1 %v860_v21, %s1979_s9  ;;  %v1007_v18 = vsel %vm427_vm6, %v1004_v48, %v1006_v7  ;;  %v1069_v21 = vrot.slane %v1063_v9, 6  ;;  %v1122_v45 = vmul.f32 %v1121_v27, %v2229_v36  ;;  %v1051_v53 = vsel %vm465_vm8, %v1048_v3, %v1050_v34 }
 0x164   : > { %v2533_v22 = vstv %s2462_s1  ;;  %v1129_v54 = vrot.slane %v2561_v35, 2  ;;  %v390_v59 = vrot.slane %v383_v38, 1  ;;  %v410_v62 = vrot.slane %v2574_v43, 2  ;;  %s2724_s1 = sld [smem:[#allocation10 + %s1288_s14]] }
 0x165   : > { %v2540_v25 = vstv %s2479_s6  ;;  %v1071_v29 = vsel %vm484_vm9, %v1069_v21, %v1070_v13  ;;  %v2578_v44 = vmul.f32 %v2533_v22, %v2229_v36  ;;  %v2612_v63 = vmul.f32 %v2533_v22, %v2240_v40  ;;  %s1332_s6 = sadd.s32 41, %s2215_s4 }
 0x166   : > { %v1128_v1 = vrot.slane %v1122_v45, 2  ;;  %v385_v3 = vmul.f32 %v382_v14, %v2268_v58  ;;  %v1073_v10 = vsel %vm484_vm9, %v1070_v13, %v1072_v55  ;;  %v1109_v12 = vrot.slane %v1102_v56, 1  ;;  %s2790_s11 = sld [smem:[#allocation10 + %s1332_s6]] }
 0x167   : > { %927 = vrot.lane.b32.xlu0 %v924_v28, %s1979_s9  ;;  %885 = vrot.lane.b32.xlu1 %v882_v30, %s1979_s9  ;;  %v2553_v30 = vmul.f32 %v382_v14, %v2240_v40  ;;  %v428_v0 = vrot.slane %v2578_v44, 3  ;;  %v1124_v14 = vmul.f32 %v1121_v27, %v2268_v58  ;;  %v1166_v4 = vmul.f32 %v2557_v32, %v2229_v36 }
 0x168   : > { %v1130_v9 = vsel %vm408_vm5, %v1128_v1, %v1129_v54  ;;  %v429_v21 = vrot.slane %v2612_v63, 3  ;;  %v2655_v27 = vmul.f32 %v2540_v25, %v2240_v40  ;;  %v1173_v38 = vrot.slane %v2626_v8, 4 }
 0x169   : > { %v391_v48 = vrot.slane %v2553_v30, 1  ;;  %v404_v55 = vmul.f32 %v2520_v15, %v2268_v58  ;;  %v1172_v16 = vrot.slane %v1166_v4, 4  ;;  %v377_v15 = vmul.f32 %v375_v11, %v2240_v40 }
 0x16a   : > { %v430_v56 = vsel %vm427_vm6, %v428_v0, %v429_v21 }
 0x16b   : > { %964 = vrot.lane.b32.xlu0 %v961_v41, %s2969_s21  ;;  %907 = vrot.lane.b32.xlu1 %v904_v42, %s1979_s9  ;;  %v1106_v41 = vrot.slane %v1100_v24, 1  ;;  %v392_v2 = vsel %vm389_vm4, %v390_v59, %v391_v48  ;;  %v2651_v24 = vmul.f32 %v2540_v25, %v2229_v36  ;;  %v1174_v0 = vsel %vm446_vm7, %v1172_v16, %v1173_v38 }
 0x16f   : > { %986 = vrot.lane.b32.xlu0 %v983_v47, %s2969_s21  ;;  %929 = vrot.lane.b32.xlu1 %v926_v50, %s1979_s9  ;;  %s1141_s9 = sadd.s32 26, %s2215_s4  ;;  %v1108_v50 = vsel %vm389_vm4, %v1106_v41, %v1107_v31  ;;  %v1131_v41 = vrot.slane %v1124_v14, 2 }
 0x170   : > { %s2494_s16 = sld [smem:[#allocation10 + %s1141_s9]] }
 0x171   : > { %s2511_s9 = sld [smem:[#allocation10 + %s1185_s0]] }
 0x172   : > { %s2525_s0 = sld [smem:[#allocation10 + %s1244_s18]]  ;;  %s1576_s18 = sshll.u32 %s1950_s24, 4 }
 0x173   : > { %1008 = vrot.lane.b32.xlu0 %v1005_v57, %s2969_s21  ;;  %966 = vrot.lane.b32.xlu1 %v963_v60, %s2969_s21  ;;  %s1207_s21 = sadd.s32 47, %s2215_s4  ;;  %v376_v57 = vmul.f32 %v375_v11, %v2229_v36  ;;  %v409_v60 = vrot.slane %v402_v39, 2  ;;  %v1110_v39 = vsel %vm389_vm4, %v1107_v31, %v1109_v12  ;;  %v1132_v11 = vsel %vm408_vm5, %v1129_v54, %v1131_v41  ;;  %s2999_s4 = smov 122  }
 0x174   : > { %s2515_s7 = sld [smem:[#allocation10 + %s1207_s21]]  ;;  %s2998_s21 = smov 123   ;;  %v2722_v12 = vmul.f32 %v2543_v26, %v2240_v40 }
 0x175   : > { %v397_v13 = vadd.f32 %v392_v2, %v376_v57  ;;  %v411_v20 = vsel %vm408_vm5, %v409_v60, %v410_v62  ;;  %v1168_v2 = vmul.f32 %v2557_v32, %v2268_v58 }
 0x176   : > { %v2547_v28 = vstv %s2494_s16  ;;  %s2818_s16 = sld [smem:[#allocation10 + %s1354_s15]] }
 0x177   : > { %1030 = vrot.lane.b32.xlu0 %v1027_v5, %s2997_s29  ;;  %988 = vrot.lane.b32.xlu1 %v985_v6, %s2997_s29  ;;  %v2570_v42 = vstv %s2511_s9  ;;  %v2594_v51 = vmul.f32 %v2547_v28, %v2240_v40  ;;  %v1144_v61 = vmul.f32 %v2547_v28, %v2229_v36  ;;  %v1146_v45 = vmul.f32 %v2547_v28, %v2268_v58  ;;  %s1393_s9 = scalar_lea.vmem %s2186_s30, %s1576_s18 [#allocation3] }
 0x178   : > { %v2597_v52 = vstv %s2525_s0  ;;  %v2671_v44 = vmul.f32 %v2570_v42, %v2240_v40  ;;  %v416_v31 = vadd.f32 %v411_v20, %v397_v13  ;;  %v466_v28 = vrot.slane %v2651_v24, 5  ;;  %s1578_s0 = sshll.u32 %s1950_s24, 1 }
 0x179   : > { %v1151_v7 = vrot.slane %v2594_v51, 3  ;;  %v1150_v19 = vrot.slane %v1144_v61, 3  ;;  %v1188_v57 = vmul.f32 %v2570_v42, %v2229_v36  ;;  %v2738_v20 = vmul.f32 %v2597_v52, %v2240_v40 }
 0x17a   : > { %v2582_v46 = vstv %s2515_s7  ;;  %v1195_v30 = vrot.slane %v2671_v44, 5  ;;  %v435_v54 = vadd.f32 %v430_v56, %v416_v31  ;;  %v1247_v51 = vmul.f32 %v2597_v52, %v2229_v36 }
 0x17b   : > { %1052 = vrot.lane.b32.xlu0 %v1049_v17, %s2997_s29  ;;  %1010 = vrot.lane.b32.xlu1 %v1007_v18, %s2997_s29  ;;  %v440_v17 = vmul.f32 %v2536_v23, %v2229_v36  ;;  %v2639_v18 = vmul.f32 %v2536_v23, %v2240_v40  ;;  %v1152_v37 = vsel %vm427_vm6, %v1150_v19, %v1151_v7  ;;  %v1194_v14 = vrot.slane %v1188_v57, 5 }
 0x17c   : > { %v2703_v1 = vmul.f32 %v2582_v46, %v2240_v40  ;;  %v1210_v35 = vmul.f32 %v2582_v46, %v2229_v36  ;;  %v1254_v57 = vrot.slane %v2738_v20, 1  ;;  %v1253_v8 = vrot.slane %v1247_v51, 1 }
 0x17d   : > { %v1196_v24 = vsel %vm465_vm8, %v1194_v14, %v1195_v30 }
 0x17e   : > { %v1217_v13 = vrot.slane %v2703_v1, 6 }
 0x17f   : > { %1074 = vrot.lane.b32.xlu0 %v1071_v29, %s2997_s29  ;;  %1032 = vrot.lane.b32.xlu1 %v1029_v33, %s2997_s29  ;;  %v393_v29 = vrot.slane %v385_v3, 1  ;;  %v467_v3 = vrot.slane %v2655_v27, 5 }
 0x181   : > { %v2584_v47 = vpop.permute.xlu1 %501  ;;  %v2587_v49 = vpop.permute.xlu0 %648  ;;  %v394_v59 = vsel %vm389_vm4, %v391_v48, %v393_v29  ;;  %v1153_v48 = vrot.slane %v1146_v45, 3  ;;  %v1175_v29 = vrot.slane %v1168_v2, 4  ;;  %v1216_v45 = vrot.slane %v1210_v35, 6  ;;  %v2786_v2 = vld [vmem:[#allocation2 + $0x5] sm:$0xff]  ;;  %v1748_v35 = vld [vmem:[#allocation2 + $0xd] sm:$0xff] }
 0x182   : > { %v398_v32 = vadd.f32 %v394_v59, %v377_v15  ;;  %v468_v43 = vsel %vm465_vm8, %v466_v28, %v467_v3  ;;  %v1212_v59 = vmul.f32 %v2582_v46, %v2268_v58 }
 0x183   : > { %1111 = vrot.lane.b32.xlu0 %v1108_v50, %s2998_s21  ;;  %1054 = vrot.lane.b32.xlu1 %v1051_v53, %s2997_s29  ;;  %v447_v50 = vrot.slane %v440_v17, 4  ;;  %v448_v53 = vrot.slane %v2639_v18, 4  ;;  %v442_v17 = vmul.f32 %v2536_v23, %v2268_v58  ;;  %v1154_v23 = vsel %vm427_vm6, %v1151_v7, %v1153_v48 }
 0x184   : > { %v478_v7 = vmul.f32 %v2543_v26, %v2229_v36  ;;  %v1218_v56 = vsel %vm484_vm9, %v1216_v45, %v1217_v13  ;;  %v1176_v36 = vsel %vm446_vm7, %v1173_v38, %v1175_v29 }
 0x185   : > { %v2619_v5 = vpop.permute.xlu1 %503  ;;  %v2621_v6 = vpop.permute.xlu0 %795 }
 0x187   : > { %1133 = vrot.lane.b32.xlu0 %v1130_v9, %s2998_s21  ;;  %1076 = vrot.lane.b32.xlu1 %v1073_v10, %s2997_s29  ;;  %v412_v9 = vrot.slane %v404_v55, 2  ;;  %v423_v10 = vmul.f32 %v2533_v22, %v2268_v58  ;;  %v449_v22 = vsel %vm446_vm7, %v447_v50, %v448_v53  ;;  %s304_s29 = sand.u32 1, %s1930_s19  }
 0x188   : > { %v454_v50 = vadd.f32 %v449_v22, %v435_v54  ;;  %s1566_s7 = sshll.u32 %s304_s29, 4 }
 0x189   : > { %v2657_v33 = vpop.permute.xlu1 %650  ;;  %v2659_v34 = vpop.permute.xlu0 %942  ;;  %v413_v41 = vsel %vm408_vm5, %v410_v62, %v412_v9  ;;  %v486_v62 = vrot.slane %v2722_v12, 6  ;;  %v1290_v9 = vstv %s2724_s1  ;;  %s306_s10 = scalar_lea.vmem [#allocation13], %s1566_s7 }
 0x18a   : > { %v417_v55 = vadd.f32 %v413_v41, %v398_v32  ;;  %v2797_v54 = vmul.f32 %v1748_v35, %v1290_v9  ;;  %v1312_v32 = vstv %s2740_s13  ;;  %s1417_s14 = sshll.u32 %s306_s10, 4  ;;  %s3000_s13 = sld [smem:[#allocation28_spill]]  ;;  %s2882_s14 = int_to_ptr.vmem [resolvable:$true] %s1417_s14 }
 0x18b   : > { %1155 = vrot.lane.b32.xlu0 %v1152_v37, %s2998_s21  ;;  %1113 = vrot.lane.b32.xlu1 %v1110_v39, %s2998_s21  ;;  %v1190_v37 = vmul.f32 %v2570_v42, %v2268_v58  ;;  %v431_v39 = vrot.slane %v423_v10, 3  ;;  %v1268_v42 = vstv %s2686_s26  ;;  %v1255_v10 = vsel %vm389_vm4, %v1253_v8, %v1254_v57  ;;  %v1749_v8 = vld [vmem:[#allocation2 + $0x15] sm:$0x3f]  ;;  %s1834_s6 = scalar_lea.vmem %s2882_s14, 256 }
 0x18c   : > { %v2775_v28 = vmul.f32 %v1268_v42, %v2240_v40  ;;  %v473_v40 = vadd.f32 %v468_v43, %v454_v50  ;;  %v1269_v46 = vmul.f32 %v2786_v2, %v1268_v42  ;;  %v2821_v50 = vmul.f32 %v1748_v35, %v1312_v32  ;;  %p1835_p3 = scmp.ne.s32.totalorder %s2882_s14, %s1834_s6 }
 0x18d   : > { %v2694_v60 = vpop.permute.xlu1 %797  ;;  %v2696_v61 = vpop.permute.xlu0 %1089  ;;  %v1197_v15 = vrot.slane %v1190_v37, 5  ;;  %v432_v48 = vsel %vm427_vm6, %v429_v21, %v431_v39  ;;  %v480_v37 = vmul.f32 %v2543_v26, %v2268_v58  ;;  %v1298_v26 = vrot.slane %v2797_v54, 3 }
 0x18e   : > { %v436_v38 = vadd.f32 %v432_v48, %v417_v55  ;;  %v1276_v22 = vrot.slane %v2775_v28, 2  ;;  %v1275_v41 = vrot.slane %v1269_v46, 2  ;;  %v1271_v18 = vmul.f32 %v1268_v42, %v2268_v58  ;;  %p1836_p4 = pnand %p1835_p3, %p3001_p1 }
 0x18f   : > { %1177 = vrot.lane.b32.xlu0 %v1174_v0, %s2998_s21  ;;  %1135 = vrot.lane.b32.xlu1 %v1132_v11, %s2998_s21  ;;  %v450_v0 = vrot.slane %v442_v17, 4  ;;  %v461_v11 = vmul.f32 %v2540_v25, %v2268_v58  ;;  %v485_v25 = vrot.slane %v478_v7, 6  ;;  %v1198_v14 = vsel %vm465_vm8, %v1195_v30, %v1197_v15 }
 0x190   : > { %v1219_v17 = vrot.slane %v1212_v59, 6  ;;  %v1277_v7 = vsel %vm408_vm5, %v1275_v41, %v1276_v22  ;;  %v1334_v28 = vstv %s2790_s11  ;;  %p1837_p6 = pneg %p1836_p4  ;;  %s1983_s11 = smov [#allocation13]  }
 0x191   : > { %v2731_v19 = vpop.permute.xlu1 %944  ;;  %v2733_v4 = vpop.permute.xlu0 %1236  ;;  %v469_v29 = vrot.slane %v461_v11, 5  ;;  %v451_v44 = vsel %vm446_vm7, %v448_v53, %v450_v0  ;;  %v1278_v0 = vrot.slane %v1271_v18, 2  ;;  %v1336_v11 = vmul.f32 %v1748_v35, %v1334_v28  ;;  %s1838_s15 = sshll.u32 %s1983_s11, 4  ;;  %s1839_s15 = int_to_ptr.vmem [resolvable:$false] %s1838_s15 }
 0x192   : > { %v455_v39 = vadd.f32 %v451_v44, %v436_v38  ;;  %v1220_v55 = vsel %vm484_vm9, %v1217_v13, %v1219_v17  ;;  %v1320_v13 = vrot.slane %v2821_v50, 4  ;;  %v1335_v46 = vmul.f32 %v2786_v2, %v1334_v28  ;;  %p1841_p10 = scmp.lt.s32.totalorder %s2882_s14, %s1839_s15 }
 0x193   : > { %1199 = vrot.lane.b32.xlu0 %v1196_v24, %s2998_s21  ;;  %1157 = vrot.lane.b32.xlu1 %v1154_v23, %s2998_s21  ;;  %v1249_v24 = vmul.f32 %v2597_v52, %v2268_v58  ;;  %v487_v23 = vsel %vm484_vm9, %v485_v25, %v486_v62  ;;  %v1291_v52 = vmul.f32 %v2786_v2, %v1290_v9 }
 0x194   : > { %v492_v30 = vadd.f32 %v487_v23, %v473_v40  ;;  %v1313_v58 = vmul.f32 %v2786_v2, %v1312_v32  ;;  %v1293_v40 = vmul.f32 %v1749_v8, %v1290_v9  ;;  %v1279_v9 = vsel %vm408_vm5, %v1276_v22, %v1278_v0 }
 0x195   : > { %v2764_v16 = vpop.permute.xlu1 %1091  ;;  %v524_v31 = vpop.permute.xlu0 %523  ;;  %v1256_v43 = vrot.slane %v1249_v24, 1  ;;  %v1297_v15 = vrot.slane %v1291_v52, 3  ;;  %v1315_v23 = vmul.f32 %v1749_v8, %v1312_v32 }
 0x196   : > { %v507_v53 = vadd.f32 %v2584_v47, %v492_v30  ;;  %v1319_v38 = vrot.slane %v1313_v58, 4  ;;  %v1300_v24 = vrot.slane %v1293_v40, 3 }
 0x197   : > { %1221 = vrot.lane.b32.xlu0 %v1218_v56, %s2998_s21  ;;  %1179 = vrot.lane.b32.xlu1 %v1176_v36, %s2998_s21  ;;  %v488_v56 = vrot.slane %v480_v37, 6  ;;  %v470_v36 = vsel %vm465_vm8, %v467_v3, %v469_v29  ;;  %v1299_v3 = vsel %vm427_vm6, %v1297_v15, %v1298_v26  ;;  %v1257_v48 = vsel %vm389_vm4, %v1254_v57, %v1256_v43 }
 0x198   : > { %v474_v42 = vadd.f32 %v470_v36, %v455_v39  ;;  %v529_v47 = vadd.f32 %v524_v31, %v507_v53  ;;  %v1321_v57 = vsel %vm446_vm7, %v1319_v38, %v1320_v13  ;;  %v1341_v29 = vrot.slane %v1335_v46, 5 }
 0x199   : > { %v2792_v63 = vpop.permute.xlu1 %1238  ;;  %v546_v21 = vpop.permute.xlu0 %545  ;;  %v489_v31 = vsel %vm484_vm9, %v486_v62, %v488_v56  ;;  %v1301_v50 = vsel %vm427_vm6, %v1298_v26, %v1300_v24  ;;  %v1322_v32 = vrot.slane %v1315_v23, 4 }
 0x19a   : > { %v551_v27 = vadd.f32 %v546_v21, %v529_v47  ;;  %v493_v25 = vadd.f32 %v489_v31, %v474_v42 }
 0x19b   : > { %1258 = vrot.lane.b32.xlu0 %v1255_v10, %s2999_s4  ;;  %1201 = vrot.lane.b32.xlu1 %v1198_v14, %s2998_s21  ;;  %v1356_v10 = vstv %s2818_s16  ;;  %v1342_v14 = vrot.slane %v1336_v11, 5  ;;  %v1323_v36 = vsel %vm446_vm7, %v1320_v13, %v1322_v32 }
 0x19c   : > { %v1358_v12 = vmul.f32 %v1748_v35, %v1356_v10  ;;  %v508_v62 = vadd.f32 %v2619_v5, %v493_v25  ;;  %v1357_v30 = vmul.f32 %v2786_v2, %v1356_v10  ;;  %v1337_v35 = vmul.f32 %v1749_v8, %v1334_v28 }
 0x19d   : > { %v526_v45 = vpop.permute.xlu1 %525  ;;  %v568_v51 = vpop.permute.xlu0 %567  ;;  %v1343_v22 = vsel %vm465_vm8, %v1341_v29, %v1342_v14 }
 0x19e   : > { %v573_v21 = vadd.f32 %v568_v51, %v551_v27  ;;  %v530_v37 = vadd.f32 %v526_v45, %v508_v62  ;;  %v1364_v52 = vrot.slane %v1358_v12, 6  ;;  %v1363_v53 = vrot.slane %v1357_v30, 6 }
 0x19f   : > { %1280 = vrot.lane.b32.xlu0 %v1277_v7, %s2999_s4  ;;  %1223 = vrot.lane.b32.xlu1 %v1220_v55, %s2998_s21  ;;  %v1359_v55 = vmul.f32 %v1749_v8, %v1356_v10  ;;  %v1344_v58 = vrot.slane %v1337_v35, 5  ;;  %s1579_s21 = sshll.u32 %s1954_s25, 3  ;;  %s2889_s25 = scalar_lea.sflag [#allocation5], %s304_s29 }
 0x1a0   : > { %v1365_v56 = vsel %vm484_vm9, %v1363_v53, %v1364_v52  ;;  %s1414_s26 = sadd.s32 %s1579_s21, %s1578_s0 }
 0x1a1   : > { %v548_v59 = vpop.permute.xlu1 %547  ;;  %v590_v1 = vpop.permute.xlu0 %589  ;;  %v1366_v28 = vrot.slane %v1359_v55, 6  ;;  %s1580_s17 = sshll.u32 %s1414_s26, 7 }
 0x1a2   : > { %v595_v17 = vadd.f32 %v590_v1, %v573_v21  ;;  %v552_v51 = vadd.f32 %v548_v59, %v530_v37  ;;  %s2887_s24 = scalar_lea.hbm %s3000_s13, %s1580_s17 }
 0x1a3   : > { %1302 = vrot.lane.b32.xlu0 %v1299_v3, %s2999_s4  ;;  %1260 = vrot.lane.b32.xlu1 %v1257_v48, %s2999_s4  ;;  %v1367_v13 = vsel %vm484_vm9, %v1364_v52, %v1366_v28 }
 0x1a5   : > { %v570_v54 = vpop.permute.xlu1 %569  ;;  %v612_v20 = vpop.permute.xlu0 %611 }
 0x1a6   : > { %v617_v44 = vadd.f32 %v612_v20, %v595_v17  ;;  %v574_v18 = vadd.f32 %v570_v54, %v552_v51 }
 0x1a7   : > { %1324 = vrot.lane.b32.xlu0 %v1321_v57, %s2999_s4  ;;  %1282 = vrot.lane.b32.xlu1 %v1279_v9, %s2999_s4 }
 0x1a9   : > { %v592_v39 = vpop.permute.xlu1 %591  ;;  %v634_v41 = vpop.permute.xlu0 %633 }
 0x1aa   : > { %v639_v5 = vadd.f32 %v634_v41, %v617_v44  ;;  %v596_v43 = vadd.f32 %v592_v39, %v574_v18 }
 0x1ab   : > { %1346 = vrot.lane.b32.xlu0 %v1343_v22, %s2999_s4  ;;  %1304 = vrot.lane.b32.xlu1 %v1301_v50, %s2999_s4 }
 0x1ac   : > { %v654_v45 = vadd.f32 %v2587_v49, %v639_v5  ;;  %v1345_v49 = vsel %vm465_vm8, %v1342_v14, %v1344_v58 }
 0x1ad   : > { %v614_v2 = vpop.permute.xlu1 %613  ;;  %v671_v7 = vpop.permute.xlu0 %670 }
 0x1ae   : > { %v618_v26 = vadd.f32 %v614_v2, %v596_v43  ;;  %v676_v11 = vadd.f32 %v671_v7, %v654_v45 }
 0x1af   : > { %1368 = vrot.lane.b32.xlu0 %v1365_v56, %s2999_s4  ;;  %1326 = vrot.lane.b32.xlu1 %v1323_v36, %s2999_s4 }
 0x1b1   : > { %v636_v42 = vpop.permute.xlu1 %635  ;;  %v693_v47 = vpop.permute.xlu0 %692 }
 0x1b2   : > { %v640_v15 = vadd.f32 %v636_v42, %v618_v26  ;;  %v698_v48 = vadd.f32 %v693_v47, %v676_v11 }
 0x1b3   : > { %1348 = vrot.lane.b32.xlu1 %v1345_v49, %s2999_s4 }
 0x1b4   : > { %v655_v59 = vadd.f32 %v2657_v33, %v640_v15 }
 0x1b5   : > { %v673_v1 = vpop.permute.xlu1 %672  ;;  %v715_v0 = vpop.permute.xlu0 %714 }
 0x1b6   : > { %v720_v8 = vadd.f32 %v715_v0, %v698_v48  ;;  %v677_v46 = vadd.f32 %v673_v1, %v655_v59 }
 0x1b7   : > { %1370 = vrot.lane.b32.xlu1 %v1367_v13, %s2999_s4  ;;  %s1840_s4 = scalar_lea.vmem %s1839_s15, 512 }
 0x1b8   : > { %p1842_p11 = scmp.lt.s32.totalorder %s1840_s4, %s1834_s6 }
 0x1b9   : > { %v695_v27 = vpop.permute.xlu1 %694  ;;  %v737_v3 = vpop.permute.xlu0 %736 }
 0x1ba   : > { %v742_v38 = vadd.f32 %v737_v3, %v720_v8  ;;  %v699_v54 = vadd.f32 %v695_v27, %v677_v46  ;;  %p1843_p5 = por %p1842_p11, %p1841_p10 }
 0x1bc   : > { %p1844_p7 = pnand %p1843_p5, %p1837_p6 }
 0x1bd   : > { %v717_v40 = vpop.permute.xlu1 %716  ;;  %v759_v31 = vpop.permute.xlu0 %758 }
 0x1be   : > { %v764_v25 = vadd.f32 %v759_v31, %v742_v38  ;;  %v721_v20 = vadd.f32 %v717_v40, %v699_v54 }
 0x1c1   : > { %v739_v21 = vpop.permute.xlu1 %738  ;;  %v781_v10 = vpop.permute.xlu0 %780 }
 0x1c2   : > { %v786_v33 = vadd.f32 %v781_v10, %v764_v25  ;;  %v743_v12 = vadd.f32 %v739_v21, %v721_v20 }
 0x1c4   : > { %v801_v57 = vadd.f32 %v2621_v6, %v786_v33 }
 0x1c5   : > { %v761_v9 = vpop.permute.xlu1 %760  ;;  %v818_v14 = vpop.permute.xlu0 %817 }
 0x1c6   : > { %v765_v62 = vadd.f32 %v761_v9, %v743_v12  ;;  %v823_v32 = vadd.f32 %v818_v14, %v801_v57 }
 0x1c9   : > { %v783_v17 = vpop.permute.xlu1 %782  ;;  %v840_v24 = vpop.permute.xlu0 %839 }
 0x1ca   : > { %v787_v23 = vadd.f32 %v783_v17, %v765_v62  ;;  %v845_v18 = vadd.f32 %v840_v24, %v823_v32 }
 0x1cc   : > { %v802_v29 = vadd.f32 %v2694_v60, %v787_v23 }
 0x1cd   : > { %v820_v37 = vpop.permute.xlu1 %819  ;;  %v862_v44 = vpop.permute.xlu0 %861 }
 0x1ce   : > { %v867_v2 = vadd.f32 %v862_v44, %v845_v18  ;;  %v824_v43 = vadd.f32 %v820_v37, %v802_v29 }
 0x1d1   : > { %v842_v30 = vpop.permute.xlu1 %841  ;;  %v884_v39 = vpop.permute.xlu0 %883 }
 0x1d2   : > { %v889_v7 = vadd.f32 %v884_v39, %v867_v2  ;;  %v846_v36 = vadd.f32 %v842_v30, %v824_v43 }
 0x1d5   : > { %v864_v41 = vpop.permute.xlu1 %863  ;;  %v906_v22 = vpop.permute.xlu0 %905 }
 0x1d6   : > { %v911_v56 = vadd.f32 %v906_v22, %v889_v7  ;;  %v868_v47 = vadd.f32 %v864_v41, %v846_v36 }
 0x1d9   : > { %v886_v52 = vpop.permute.xlu1 %885  ;;  %v928_v35 = vpop.permute.xlu0 %927 }
 0x1da   : > { %v933_v58 = vadd.f32 %v928_v35, %v911_v56  ;;  %v890_v15 = vadd.f32 %v886_v52, %v868_v47 }
 0x1dc   : > { %v948_v49 = vadd.f32 %v2659_v34, %v933_v58 }
 0x1dd   : > { %v908_v51 = vpop.permute.xlu1 %907  ;;  %v965_v5 = vpop.permute.xlu0 %964 }
 0x1de   : > { %v912_v1 = vadd.f32 %v908_v51, %v890_v15  ;;  %v970_v0 = vadd.f32 %v965_v5, %v948_v49 }
 0x1e1   : > { %v930_v6 = vpop.permute.xlu1 %929  ;;  %v987_v50 = vpop.permute.xlu0 %986 }
 0x1e2   : > { %v934_v13 = vadd.f32 %v930_v6, %v912_v1  ;;  %v992_v3 = vadd.f32 %v987_v50, %v970_v0 }
 0x1e4   : > { %v949_v48 = vadd.f32 %v2731_v19, %v934_v13 }
 0x1e5   : > { %v967_v45 = vpop.permute.xlu1 %966  ;;  %v1009_v53 = vpop.permute.xlu0 %1008 }
 0x1e6   : > { %v1014_v8 = vadd.f32 %v1009_v53, %v992_v3  ;;  %v971_v46 = vadd.f32 %v967_v45, %v949_v48 }
 0x1e9   : > { %v989_v55 = vpop.permute.xlu1 %988  ;;  %v1031_v60 = vpop.permute.xlu0 %1030 }
 0x1ea   : > { %v1036_v38 = vadd.f32 %v1031_v60, %v1014_v8  ;;  %v993_v54 = vadd.f32 %v989_v55, %v971_v46 }
 0x1ed   : > { %v1011_v26 = vpop.permute.xlu1 %1010  ;;  %v1053_v42 = vpop.permute.xlu0 %1052 }
 0x1ee   : > { %v1058_v25 = vadd.f32 %v1053_v42, %v1036_v38  ;;  %v1015_v33 = vadd.f32 %v1011_v26, %v993_v54 }
 0x1f1   : > { %v1033_v28 = vpop.permute.xlu1 %1032  ;;  %v1075_v59 = vpop.permute.xlu0 %1074 }
 0x1f2   : > { %v1080_v34 = vadd.f32 %v1075_v59, %v1058_v25  ;;  %v1037_v9 = vadd.f32 %v1033_v28, %v1015_v33  ;;  %v1377_v28 = vstv %s1376_s5  ;;  %v1395_v33 = vld [vmem:[%s1393_s9 + $0x8] sm:$0xff] }
 0x1f4   : > { %v1095_v14 = vadd.f32 %v2696_v61, %v1080_v34 }
 0x1f5   : > { %v1055_v11 = vpop.permute.xlu1 %1054  ;;  %v1112_v27 = vpop.permute.xlu0 %1111 }
 0x1f6   : > { %v1059_v12 = vadd.f32 %v1055_v11, %v1037_v9  ;;  %v1117_v19 = vadd.f32 %v1112_v27, %v1095_v14 }
 0x1f9   : > { %v1077_v40 = vpop.permute.xlu1 %1076  ;;  %v1134_v31 = vpop.permute.xlu0 %1133 }
 0x1fa   : > { %v1081_v24 = vadd.f32 %v1077_v40, %v1059_v12  ;;  %v1139_v23 = vadd.f32 %v1134_v31, %v1117_v19 }
 0x1fc   : > { %v1096_v44 = vadd.f32 %v2764_v16, %v1081_v24 }
 0x1fd   : > { %v1114_v21 = vpop.permute.xlu1 %1113  ;;  %v1156_v10 = vpop.permute.xlu0 %1155 }
 0x1fe   : > { %v1161_v30 = vadd.f32 %v1156_v10, %v1139_v23  ;;  %v1118_v52 = vadd.f32 %v1114_v21, %v1096_v44  ;;  %v1394_v10 = vld [vmem:[%s1393_s9] sm:$0xff] }
 0x201   : > { %v1136_v20 = vpop.permute.xlu1 %1135  ;;  %v1178_v57 = vpop.permute.xlu0 %1177 }
 0x202   : > { %v1183_v39 = vadd.f32 %v1178_v57, %v1161_v30  ;;  %v1140_v51 = vadd.f32 %v1136_v20, %v1118_v52 }
 0x205   : > { %v1158_v62 = vpop.permute.xlu1 %1157  ;;  %v1200_v17 = vpop.permute.xlu0 %1199 }
 0x206   : > { %v1205_v35 = vadd.f32 %v1200_v17, %v1183_v39  ;;  %v1162_v50 = vadd.f32 %v1158_v62, %v1140_v51 }
 0x209   : > { %v1180_v29 = vpop.permute.xlu1 %1179  ;;  %v1222_v37 = vpop.permute.xlu0 %1221 }
 0x20a   : > { %v1227_v5 = vadd.f32 %v1222_v37, %v1205_v35  ;;  %v1184_v32 = vadd.f32 %v1180_v29, %v1162_v50 }
 0x20c   : > { %v1242_v18 = vadd.f32 %v2733_v4, %v1227_v5 }
 0x20d   : > { %v1202_v41 = vpop.permute.xlu1 %1201  ;;  %v1259_v22 = vpop.permute.xlu0 %1258 }
 0x20e   : > { %v1206_v2 = vadd.f32 %v1202_v41, %v1184_v32  ;;  %v1264_v7 = vadd.f32 %v1259_v22, %v1242_v18 }
 0x211   : > { %v1224_v61 = vpop.permute.xlu1 %1223  ;;  %v1281_v6 = vpop.permute.xlu0 %1280 }
 0x212   : > { %v1228_v16 = vadd.f32 %v1224_v61, %v1206_v2  ;;  %v1286_v43 = vadd.f32 %v1281_v6, %v1264_v7 }
 0x214   : > { %v1243_v56 = vadd.f32 %v2792_v63, %v1228_v16 }
 0x215   : > { %v1261_v45 = vpop.permute.xlu1 %1260  ;;  %v1303_v53 = vpop.permute.xlu0 %1302 }
 0x216   : > { %v1308_v36 = vadd.f32 %v1303_v53, %v1286_v43  ;;  %v1265_v47 = vadd.f32 %v1261_v45, %v1243_v56 }
 0x219   : > { %v1283_v55 = vpop.permute.xlu1 %1282  ;;  %v1325_v60 = vpop.permute.xlu0 %1324 }
 0x21a   : > { %v1330_v42 = vadd.f32 %v1325_v60, %v1308_v36  ;;  %v1287_v59 = vadd.f32 %v1283_v55, %v1265_v47 }
 0x21d   : > { %v1305_v58 = vpop.permute.xlu1 %1304  ;;  %v1347_v26 = vpop.permute.xlu0 %1346 }
 0x21e   : > { %v1352_v15 = vadd.f32 %v1347_v26, %v1330_v42  ;;  %v1309_v0 = vadd.f32 %v1305_v58, %v1287_v59 }
 0x221   : > { %v1327_v49 = vpop.permute.xlu1 %1326  ;;  %v1369_v4 = vpop.permute.xlu0 %1368 }
 0x222   : > { %v1374_v1 = vadd.f32 %v1369_v4, %v1352_v15  ;;  %v1331_v27 = vadd.f32 %v1327_v49, %v1309_v0 }
 0x224   : > { %v1378_v13 = vadd.f32 %v1377_v28, %v1374_v1 }
 0x225   : > { %v1349_v11 = vpop.permute.xlu1 %1348 }
 0x226   : > { %v1574_v3 = vmul.f32 -1.442695, %v1378_v13  ;;  %v1353_v63 = vadd.f32 %v1349_v11, %v1331_v27 }
 0x228   : > { %1739 = vpow2.f32 %v1574_v3 }
 0x229   : > { %v1371_v48 = vpop.permute.xlu1 %1370 }
 0x22a   : > { %v1375_v8 = vadd.f32 %v1371_v48, %v1353_v63 }
 0x22c   : > { %v1379_v40 = vadd.f32 %v1377_v28, %v1375_v8 }
 0x22e   : > { %v1575_v31 = vmul.f32 -1.442695, %v1379_v40 }
 0x230   : > { %1741 = vpow2.f32 %v1575_v31 }
 0x235   : > { %v1740_v38 = vpop.eup %1739 }
 0x236   : > { %v1386_v46 = vadd.f32 1.0, %v1740_v38 }
 0x238   : > { %1743 = vrcp.f32 %v1386_v46 }
 0x23d   : > { %v1742_v25 = vpop.eup %1741 }
 0x23e   : > { %v1387_v21 = vadd.f32 1.0, %v1742_v25 }
 0x240   : > { %1745 = vrcp.f32 %v1387_v21 }
 0x245   : > { %v1744_v54 = vpop.eup %1743 }
 0x246   : > { %v1396_v34 = vmul.f32 %v1744_v54, %v1394_v10 }
 0x248   : > { %1399 = vst.msk [vmem:[%s306_s10] sm:$0xff] %vm1398_vm10, %v1396_v34 }
 0x24d   : > { %v1746_v20 = vpop.eup %1745 }
 0x24e   : > { %v1397_v57 = vmul.f32 %v1746_v20, %v1395_v33 }
 0x250   : > { %1400 = vst.msk [vmem:[%s306_s10 + $0x8] sm:$0xff] %vm1398_vm10, %v1397_v57 }
 0x251   : > { %1847 = shalt.err (!%p1844_p7)
}
 0x252   : > { %s1848_s16 = scalar_lea.hbm %s2887_s24, 256  ;;  %s1852_s29 = scalar_lea.hbm %s3000_s13, 2048 }
 0x253   : > { %p1849_p2 = scmp.ne.s32.totalorder %s2887_s24, %s1848_s16  ;;  %p1853_p12 = scmp.lt.s32.totalorder %s2887_s24, %s3000_s13 }
 0x254   : > { %p1854_p0 = scmp.lt.s32.totalorder %s1852_s29, %s1848_s16 }
 0x255   : > { %p1850_p8 = pnand %p1849_p2, %p3001_p1 }
 0x256   : > { %p1855_p13 = por %p1854_p0, %p1853_p12 }
 0x257   : > { %p1851_p9 = pneg %p1850_p8 }
 0x259   : > { %p1856_p3 = pnand %p1855_p13, %p1851_p9 }
 0x25b   : > { %1859 = shalt.err (!%p1856_p3)
}
 0x25c   : > { %s1984_s0 = smov 128   ;;  %s1985_s21 = smov 8  }
 0x25d   : > { %1602 = dma.vmem_to_hbm [thread:$0]  (%p3001_p1), %s2882_s14, 256, %s2887_s24, %s2889_s25, %s1984_s0, %s1984_s0, %s1985_s21  }
 0x25e PF: > { %s3002_s10 = sld [smem:[#allocation19_spill]]  ;;  %p1634_p4 = scmp.ge.s32.totalorder %s1966_s28, 2 }
 0x25f   : > { %s3003_s26 = sld [smem:[#allocation21_spill]] }
 0x264   : > { %s1432_s17 = sand.u32 1, %s3002_s10  }
 0x265   : > { %p3004_p6 = scmp.ne.s32.totalorder %s3003_s26, 0  ;;  %s1433_s30 = scalar_lea.sflag [#allocation5], %s1432_s17 }
 0x267   : > { %p1622_p10 = pnand %p1634_p4, %p3004_p6 }
 0x269   : > { %p1623_p11 = pneg %p1622_p10 }
 0x26b   : > { %1921 = dma.done.wait (%p1623_p11), %s1433_s30, 256  }
 0x26c   : > { %1923 = vsyncadd (%p1623_p11), %s1433_s30, 4294967040  ;;  %s24_s28 = sadd.s32 1, %s1966_s28   ;;  %s3005_s24 = sld [smem:[#allocation20_spill]] }
 0x26d   : > { %p21_p5 = scmp.ge.s32.totalorder %s24_s28, 10   ;;  %s3006_s26 = sld [smem:[#allocation22_spill]] }
 0x26e   : > { %s3007_s18 = smov %s1930_s19  ;;  %s3008_s19 = smov %s1934_s20 }
 0x26f   : > { %s3009_s20 = smov %s2166_s3  ;;  %s3010_s21 = smov %s1942_s22 }
 0x270   : > { %s3011_s22 = smov %s1946_s23  ;;  %s3012_s23 = smov %s2163_s2 }
 0x271   : > { %s3013_s25 = smov %s1962_s27  ;;  %s3014_s27 = smov %s3020_s12 }
 0x272   :  { %23 = sbr.rel (!%p21_p5) target bundleno = 19 (0x13), region = 107 }
 0x277   :  { %1438 = vsyncpa [#allocation4], 1 }
 0x278   :  { %1440 = vsyncpa [#allocation4 + $0x1], 1 }
 0x279   :  { %1441 = vsyncpa [#allocation5], 1 }
 0x27a   :  { %1443 = vsyncpa [#allocation5 + $0x1], 1 }
 0x27b   :  { %1444 = vsyncpa [#allocation6], 1 }
 0x27c   :  { %1446 = vsyncpa [#allocation6 + $0x1], 1 }
 0x27d   :  { %1447 = vsyncpa [#allocation7], 1 }
 0x27e   :  { %1449 = vsyncpa [#allocation7 + $0x1], 1 }
 0x27f   :  { %1450 = vsyncpa [#allocation11], 1 }

</bundles_post_ra>
